<compile_context>
chip_gen: v5e
topology: v5e:2x2
jax: 0.10.0
libtpu: 0.0.40
codegen_flags: <defaults>
</compile_context>

<pallas_src>
import functools

import jax
import jax.numpy as jnp
from jax.experimental import pallas as pl
from jax.experimental.pallas import tpu as pltpu

# Per-head padded hidden widths (multiples of 128) and fused output width.
H1 = 512            # 400 padded
H2 = 384            # 300 padded
HEAD_OUT = 128      # lane-dense output slab; cols 0/1 hold q1/q2
MAX_TILE_B = 1024   # batch tile per grid step for large batches


def critic_kernel(x_ref, wA_ref, bA_ref, wB1_ref, bB1_ref, wB2_ref, bB2_ref,
                  wC1_ref, wC2_ref, bC_ref, out_ref):
    x = x_ref[...]                                                  # (TB, Dpad) bf16

    # Fused layer 1 (both heads): (TB, Dpad) @ (Dpad, 2*H1)
    h = jnp.dot(x, wA_ref[...], preferred_element_type=jnp.float32) + bA_ref[...]
    h = jnp.maximum(h, 0.0).astype(jnp.bfloat16)                    # (TB, 1024)

    # Layer 2, split per head (no zero-block MACs). H1 is 128-aligned, so the
    # static slices are lane-tile aligned (no layout shuffle).
    h1 = h[:, :H1]                                                  # (TB, 512)
    h2 = h[:, H1:]                                                  # (TB, 512)
    g1 = jnp.dot(h1, wB1_ref[...], preferred_element_type=jnp.float32) + bB1_ref[...]
    g2 = jnp.dot(h2, wB2_ref[...], preferred_element_type=jnp.float32) + bB2_ref[...]
    g1 = jnp.maximum(g1, 0.0).astype(jnp.bfloat16)                  # (TB, 384)
    g2 = jnp.maximum(g2, 0.0).astype(jnp.bfloat16)                  # (TB, 384)

    # Layer 3, per head, accumulated in f32 into the lane-dense output slab.
    q = jnp.dot(g1, wC1_ref[...], preferred_element_type=jnp.float32)
    q = q + jnp.dot(g2, wC2_ref[...], preferred_element_type=jnp.float32)
    out_ref[...] = q + bC_ref[...]                                  # (TB, 128) f32


def make_critic_params(state_dim, action_dim, key):
    """PyTorch nn.Linear-style init: U(-1/sqrt(fan_in), 1/sqrt(fan_in)).
    Weights stored as (in, out) so layers compute x @ W + b. f32 canonical."""
    dims = [
        (state_dim + action_dim, 400),
        (400, 300),
        (300, 1),
        (state_dim + action_dim, 400),
        (400, 300),
        (300, 1),
    ]
    params = []
    keys = jax.random.split(key, len(dims) * 2)
    for i, (fan_in, fan_out) in enumerate(dims):
        bound = 1.0 / (fan_in ** 0.5)
        w = jax.random.uniform(keys[2 * i], (fan_in, fan_out),
                               minval=-bound, maxval=bound, dtype=jnp.float32)
        b = jax.random.uniform(keys[2 * i + 1], (1, fan_out),
                               minval=-bound, maxval=bound, dtype=jnp.float32)
        params.append((w, b))
    return params


def pack_critic_params(params, state_dim, action_dim):
    """Fuse the twin heads into padded, 128-aligned (bf16 weight, f32 bias) ops:
       A : (Dpad, 1024)   = [W1 | W4]                (shared layer-1 matmul)
       B1: (512, 384)     = W2 padded                (per-head layer 2)
       B2: (512, 384)     = W5 padded
       C1: (384, 128)     col 0 = w3                 (per-head layer 3, summed)
       C2: (384, 128)     col 1 = w6
    All padding entries are exactly zero."""
    D = state_dim + action_dim
    d_pad = ((D + 127) // 128) * 128
    (w1, b1), (w2, b2), (w3, b3), (w4, b4), (w5, b5), (w6, b6) = params

    wA = jnp.zeros((d_pad, 2 * H1), jnp.float32)
    wA = wA.at[:D, :400].set(w1).at[:D, H1:H1 + 400].set(w4)
    bA = jnp.zeros((1, 2 * H1), jnp.float32)
    bA = bA.at[:, :400].set(b1).at[:, H1:H1 + 400].set(b4)

    wB1 = jnp.zeros((H1, H2), jnp.float32).at[:400, :300].set(w2)
    bB1 = jnp.zeros((1, H2), jnp.float32).at[:, :300].set(b2)
    wB2 = jnp.zeros((H1, H2), jnp.float32).at[:400, :300].set(w5)
    bB2 = jnp.zeros((1, H2), jnp.float32).at[:, :300].set(b5)

    wC1 = jnp.zeros((H2, HEAD_OUT), jnp.float32).at[:300, 0:1].set(w3)
    wC2 = jnp.zeros((H2, HEAD_OUT), jnp.float32).at[:300, 1:2].set(w6)
    bC = jnp.zeros((1, HEAD_OUT), jnp.float32)
    bC = bC.at[:, 0:1].set(b3).at[:, 1:2].set(b6)

    return (wA.astype(jnp.bfloat16), bA,
            wB1.astype(jnp.bfloat16), bB1,
            wB2.astype(jnp.bfloat16), bB2,
            wC1.astype(jnp.bfloat16), wC2.astype(jnp.bfloat16), bC)


@functools.partial(jax.jit, static_argnames=("tile_b",))
def _critic_call(x_padded, wA, bA, wB1, bB1, wB2, bB2, wC1, wC2, bC, *, tile_b):
    bp, d = x_padded.shape
    grid = (bp // tile_b,)

    # Honest scheduler hint, recomputed for the split layer B.
    flops = 2 * bp * (d * (2 * H1) + 2 * (H1 * H2) + 2 * (H2 * HEAD_OUT))
    bytes_accessed = (
        2 * (wA.size + wB1.size + wB2.size + wC1.size + wC2.size)   # bf16 weights
        + 4 * (bA.size + bB1.size + bB2.size + bC.size)             # f32 biases
        + 2 * bp * d                                                # bf16 input stream
        + 4 * bp * HEAD_OUT                                         # f32 output slab
    )

    def resident(shape):
        return pl.BlockSpec(shape, lambda i: (0, 0))   # weights held in VMEM

    return pl.pallas_call(
        critic_kernel,
        out_shape=jax.ShapeDtypeStruct((bp, HEAD_OUT), jnp.float32),
        grid_spec=pl.GridSpec(
            grid=grid,
            in_specs=[
                pl.BlockSpec((tile_b, d), lambda i: (i, 0)),   # x: streamed over batch
                resident(wA.shape), resident(bA.shape),
                resident(wB1.shape), resident(bB1.shape),
                resident(wB2.shape), resident(bB2.shape),
                resident(wC1.shape), resident(wC2.shape),
                resident(bC.shape),
            ],
            out_specs=pl.BlockSpec((tile_b, HEAD_OUT), lambda i: (i, 0)),
        ),
        compiler_params=pltpu.CompilerParams(
            dimension_semantics=("parallel",),
            vmem_limit_bytes=48 * 1024 * 1024,
        ),
        cost_estimate=pl.CostEstimate(
            flops=int(flops), transcendentals=0, bytes_accessed=int(bytes_accessed)),
    )(x_padded, wA, bA, wB1, bB1, wB2, bB2, wC1, wC2, bC)


def _batch_tiling(batch):
    """Small-batch path: single tile rounded to the bf16 sublane quantum (16).
    Large-batch path: TILE_B = 1024 to amortize per-grid-step overhead."""
    pb = max(16, ((batch + 15) // 16) * 16)
    if pb <= MAX_TILE_B:
        return pb, pb
    pb = ((batch + MAX_TILE_B - 1) // MAX_TILE_B) * MAX_TILE_B
    return pb, MAX_TILE_B


def critic_forward(state, action, packed_params):
    """Twin-Q forward pass. Concatenation / padding / slicing are glue in JAX."""
    x = jnp.concatenate([state, action], axis=1).astype(jnp.bfloat16)
    batch, d = x.shape
    d_pad = packed_params[0].shape[0]                # wA rows (feature padding)
    pb, tile_b = _batch_tiling(batch)
    x = jnp.pad(x, ((0, pb - batch), (0, d_pad - d)))

    out = _critic_call(x, *packed_params, tile_b=tile_b)
    q1 = out[:batch, 0:1]
    q2 = out[:batch, 1:2]
    return q1, q2


def critic_forward_ref(state, action, params):
    """Pure-JAX reference mirroring the kernel's numeric path (bf16 weights/acts,
    f32 accumulation), with the original unfused / unpadded layer structure."""
    x = jnp.concatenate([state, action], axis=1).astype(jnp.bfloat16)

    def layer(h, w, b, relu=True):
        y = jnp.dot(h, w.astype(jnp.bfloat16),
                    preferred_element_type=jnp.float32) + b
        if relu:
            y = jnp.maximum(y, 0.0).astype(jnp.bfloat16)
        return y

    (w1, b1), (w2, b2), (w3, b3), (w4, b4), (w5, b5), (w6, b6) = params
    h = layer(x, w1, b1)
    h = layer(h, w2, b2)
    q1 = layer(h, w3, b3, relu=False)
    g = layer(x, w4, b4)
    g = layer(g, w5, b5)
    q2 = layer(g, w6, b6, relu=False)
    return q1, q2


if __name__ == "__main__":
    key = jax.random.PRNGKey(0)
    k_state, k_action, k_params = jax.random.split(key, 3)

    state_dim, action_dim, batch = 24, 8, 8
    state = jax.random.normal(k_state, (batch, state_dim), dtype=jnp.float32)
    action = jax.random.normal(k_action, (batch, action_dim), dtype=jnp.float32)

    params = make_critic_params(state_dim, action_dim, k_params)
    packed = pack_critic_params(params, state_dim, action_dim)

    q1, q2 = critic_forward(state, action, packed)
    jax.block_until_ready((q1, q2))

    q1_ref, q2_ref = critic_forward_ref(state, action, params)
    assert q1.shape == (batch, 1) and q2.shape == (batch, 1)
    assert jnp.allclose(q1, q1_ref, atol=1e-2, rtol=1e-2), (q1, q1_ref)
    assert jnp.allclose(q2, q2_ref, atol=1e-2, rtol=1e-2), (q2, q2_ref)

    print("KERNEL_OK")
</pallas_src>

<mosaic_0001>
module attributes {stable_mosaic.version = 11 : i64} {
  func.func @critic_kernel(%arg0: i32, %arg1: memref<16x128xbf16, #tpu.memory_space<vmem>>, %arg2: memref<128x1024xbf16, #tpu.memory_space<vmem>>, %arg3: memref<1x1024xf32, #tpu.memory_space<vmem>>, %arg4: memref<512x384xbf16, #tpu.memory_space<vmem>>, %arg5: memref<1x384xf32, #tpu.memory_space<vmem>>, %arg6: memref<512x384xbf16, #tpu.memory_space<vmem>>, %arg7: memref<1x384xf32, #tpu.memory_space<vmem>>, %arg8: memref<384x128xbf16, #tpu.memory_space<vmem>>, %arg9: memref<384x128xbf16, #tpu.memory_space<vmem>>, %arg10: memref<1x128xf32, #tpu.memory_space<vmem>>, %arg11: memref<16x128xf32, #tpu.memory_space<vmem>>) attributes {dimension_semantics = [#tpu.dimension_semantics<parallel>], iteration_bounds = array<i64: 1>, scalar_prefetch = 0 : i64, scratch_operands = 0 : i64, tpu.core_type = #tpu.core_type<tc>, window_params = [{transform_indices = @transform_0, window_bounds = array<i64: 16, 128>}, {pipeline_mode = #tpu.pipeline_mode<synchronous>, transform_indices = @transform_1, window_bounds = array<i64: 128, 1024>}, {pipeline_mode = #tpu.pipeline_mode<synchronous>, transform_indices = @transform_2, window_bounds = array<i64: 1, 1024>}, {pipeline_mode = #tpu.pipeline_mode<synchronous>, transform_indices = @transform_3, window_bounds = array<i64: 512, 384>}, {pipeline_mode = #tpu.pipeline_mode<synchronous>, transform_indices = @transform_4, window_bounds = array<i64: 1, 384>}, {pipeline_mode = #tpu.pipeline_mode<synchronous>, transform_indices = @transform_5, window_bounds = array<i64: 512, 384>}, {pipeline_mode = #tpu.pipeline_mode<synchronous>, transform_indices = @transform_6, window_bounds = array<i64: 1, 384>}, {pipeline_mode = #tpu.pipeline_mode<synchronous>, transform_indices = @transform_7, window_bounds = array<i64: 384, 128>}, {pipeline_mode = #tpu.pipeline_mode<synchronous>, transform_indices = @transform_8, window_bounds = array<i64: 384, 128>}, {pipeline_mode = #tpu.pipeline_mode<synchronous>, transform_indices = @transform_9, window_bounds = array<i64: 1, 128>}, {transform_indices = @transform_10, window_bounds = array<i64: 16, 128>}]} {
    %c0 = arith.constant 0 : index
    %c0_0 = arith.constant 0 : index
    %0 = vector.load %arg1[%c0, %c0_0] : memref<16x128xbf16, #tpu.memory_space<vmem>>, vector<16x128xbf16>
    %c0_1 = arith.constant 0 : index
    %c0_2 = arith.constant 0 : index
    %1 = vector.load %arg2[%c0_1, %c0_2] : memref<128x1024xbf16, #tpu.memory_space<vmem>>, vector<128x1024xbf16>
    %cst = arith.constant dense<0.000000e+00> : vector<16x1024xf32>
    %2 = tpu.matmul %0, %1, %cst {dimension_numbers = #tpu.dot_dimension_numbers<[1], [0], [0], [1], [0, 0, 1, 1], [], []>} : vector<16x128xbf16>, vector<128x1024xbf16>, vector<16x1024xf32> -> vector<16x1024xf32>
    %c0_3 = arith.constant 0 : index
    %c0_4 = arith.constant 0 : index
    %3 = vector.load %arg3[%c0_3, %c0_4] : memref<1x1024xf32, #tpu.memory_space<vmem>>, vector<1x1024xf32>
    %4 = vector.broadcast %3 : vector<1x1024xf32> to vector<16x1024xf32>
    %5 = arith.addf %2, %4 : vector<16x1024xf32>
    %cst_5 = arith.constant 0.000000e+00 : f32
    %6 = vector.broadcast %cst_5 : f32 to vector<16x1024xf32>
    %7 = arith.maximumf %5, %6 : vector<16x1024xf32>
    %8 = arith.truncf %7 : vector<16x1024xf32> to vector<16x1024xbf16>
    %9 = vector.extract_strided_slice %8 {offsets = [0, 0], sizes = [16, 512], strides = [1, 1]} : vector<16x1024xbf16> to vector<16x512xbf16>
    %10 = vector.extract_strided_slice %8 {offsets = [0, 512], sizes = [16, 512], strides = [1, 1]} : vector<16x1024xbf16> to vector<16x512xbf16>
    %c0_6 = arith.constant 0 : index
    %c0_7 = arith.constant 0 : index
    %11 = vector.load %arg4[%c0_6, %c0_7] : memref<512x384xbf16, #tpu.memory_space<vmem>>, vector<512x384xbf16>
    %cst_8 = arith.constant dense<0.000000e+00> : vector<16x384xf32>
    %12 = tpu.matmul %9, %11, %cst_8 {dimension_numbers = #tpu.dot_dimension_numbers<[1], [0], [0], [1], [0, 0, 1, 1], [], []>} : vector<16x512xbf16>, vector<512x384xbf16>, vector<16x384xf32> -> vector<16x384xf32>
    %c0_9 = arith.constant 0 : index
    %c0_10 = arith.constant 0 : index
    %13 = vector.load %arg5[%c0_9, %c0_10] : memref<1x384xf32, #tpu.memory_space<vmem>>, vector<1x384xf32>
    %14 = vector.broadcast %13 : vector<1x384xf32> to vector<16x384xf32>
    %15 = arith.addf %12, %14 : vector<16x384xf32>
    %c0_11 = arith.constant 0 : index
    %c0_12 = arith.constant 0 : index
    %16 = vector.load %arg6[%c0_11, %c0_12] : memref<512x384xbf16, #tpu.memory_space<vmem>>, vector<512x384xbf16>
    %cst_13 = arith.constant dense<0.000000e+00> : vector<16x384xf32>
    %17 = tpu.matmul %10, %16, %cst_13 {dimension_numbers = #tpu.dot_dimension_numbers<[1], [0], [0], [1], [0, 0, 1, 1], [], []>} : vector<16x512xbf16>, vector<512x384xbf16>, vector<16x384xf32> -> vector<16x384xf32>
    %c0_14 = arith.constant 0 : index
    %c0_15 = arith.constant 0 : index
    %18 = vector.load %arg7[%c0_14, %c0_15] : memref<1x384xf32, #tpu.memory_space<vmem>>, vector<1x384xf32>
    %19 = vector.broadcast %18 : vector<1x384xf32> to vector<16x384xf32>
    %20 = arith.addf %17, %19 : vector<16x384xf32>
    %cst_16 = arith.constant 0.000000e+00 : f32
    %21 = vector.broadcast %cst_16 : f32 to vector<16x384xf32>
    %22 = arith.maximumf %15, %21 : vector<16x384xf32>
    %23 = arith.truncf %22 : vector<16x384xf32> to vector<16x384xbf16>
    %cst_17 = arith.constant 0.000000e+00 : f32
    %24 = vector.broadcast %cst_17 : f32 to vector<16x384xf32>
    %25 = arith.maximumf %20, %24 : vector<16x384xf32>
    %26 = arith.truncf %25 : vector<16x384xf32> to vector<16x384xbf16>
    %c0_18 = arith.constant 0 : index
    %c0_19 = arith.constant 0 : index
    %27 = vector.load %arg8[%c0_18, %c0_19] : memref<384x128xbf16, #tpu.memory_space<vmem>>, vector<384x128xbf16>
    %cst_20 = arith.constant dense<0.000000e+00> : vector<16x128xf32>
    %28 = tpu.matmul %23, %27, %cst_20 {dimension_numbers = #tpu.dot_dimension_numbers<[1], [0], [0], [1], [0, 0, 1, 1], [], []>} : vector<16x384xbf16>, vector<384x128xbf16>, vector<16x128xf32> -> vector<16x128xf32>
    %c0_21 = arith.constant 0 : index
    %c0_22 = arith.constant 0 : index
    %29 = vector.load %arg9[%c0_21, %c0_22] : memref<384x128xbf16, #tpu.memory_space<vmem>>, vector<384x128xbf16>
    %cst_23 = arith.constant dense<0.000000e+00> : vector<16x128xf32>
    %30 = tpu.matmul %26, %29, %cst_23 {dimension_numbers = #tpu.dot_dimension_numbers<[1], [0], [0], [1], [0, 0, 1, 1], [], []>} : vector<16x384xbf16>, vector<384x128xbf16>, vector<16x128xf32> -> vector<16x128xf32>
    %31 = arith.addf %28, %30 : vector<16x128xf32>
    %c0_24 = arith.constant 0 : index
    %c0_25 = arith.constant 0 : index
    %32 = vector.load %arg10[%c0_24, %c0_25] : memref<1x128xf32, #tpu.memory_space<vmem>>, vector<1x128xf32>
    %33 = vector.broadcast %32 : vector<1x128xf32> to vector<16x128xf32>
    %34 = arith.addf %31, %33 : vector<16x128xf32>
    %c0_26 = arith.constant 0 : index
    %c0_27 = arith.constant 0 : index
    %35 = vector.load %arg11[%c0_26, %c0_27] : memref<16x128xf32, #tpu.memory_space<vmem>>, vector<16x128xf32>
    tpu.vector_store %arg11[%c0_26, %c0_27], %34 {strides = array<i32>} : memref<16x128xf32, #tpu.memory_space<vmem>>, vector<16x128xf32>,
    return
  }
  func.func @transform_0(%arg0: i32) -> (i32, i32) {
    %c0_i32 = arith.constant 0 : i32
    %c0_i32_0 = arith.constant 0 : i32
    return %arg0, %c0_i32 : i32, i32
  }
  func.func @transform_1(%arg0: i32) -> (i32, i32) {
    %c0_i32 = arith.constant 0 : i32
    %c0_i32_0 = arith.constant 0 : i32
    %c0_i32_1 = arith.constant 0 : i32
    return %c0_i32, %c0_i32_0 : i32, i32
  }
  func.func @transform_2(%arg0: i32) -> (i32, i32) {
    %c0_i32 = arith.constant 0 : i32
    %c0_i32_0 = arith.constant 0 : i32
    %c0_i32_1 = arith.constant 0 : i32
    return %c0_i32, %c0_i32_0 : i32, i32
  }
  func.func @transform_3(%arg0: i32) -> (i32, i32) {
    %c0_i32 = arith.constant 0 : i32
    %c0_i32_0 = arith.constant 0 : i32
    %c0_i32_1 = arith.constant 0 : i32
    return %c0_i32, %c0_i32_0 : i32, i32
  }
  func.func @transform_4(%arg0: i32) -> (i32, i32) {
    %c0_i32 = arith.constant 0 : i32
    %c0_i32_0 = arith.constant 0 : i32
    %c0_i32_1 = arith.constant 0 : i32
    return %c0_i32, %c0_i32_0 : i32, i32
  }
  func.func @transform_5(%arg0: i32) -> (i32, i32) {
    %c0_i32 = arith.constant 0 : i32
    %c0_i32_0 = arith.constant 0 : i32
    %c0_i32_1 = arith.constant 0 : i32
    return %c0_i32, %c0_i32_0 : i32, i32
  }
  func.func @transform_6(%arg0: i32) -> (i32, i32) {
    %c0_i32 = arith.constant 0 : i32
    %c0_i32_0 = arith.constant 0 : i32
    %c0_i32_1 = arith.constant 0 : i32
    return %c0_i32, %c0_i32_0 : i32, i32
  }
  func.func @transform_7(%arg0: i32) -> (i32, i32) {
    %c0_i32 = arith.constant 0 : i32
    %c0_i32_0 = arith.constant 0 : i32
    %c0_i32_1 = arith.constant 0 : i32
    return %c0_i32, %c0_i32_0 : i32, i32
  }
  func.func @transform_8(%arg0: i32) -> (i32, i32) {
    %c0_i32 = arith.constant 0 : i32
    %c0_i32_0 = arith.constant 0 : i32
    %c0_i32_1 = arith.constant 0 : i32
    return %c0_i32, %c0_i32_0 : i32, i32
  }
  func.func @transform_9(%arg0: i32) -> (i32, i32) {
    %c0_i32 = arith.constant 0 : i32
    %c0_i32_0 = arith.constant 0 : i32
    %c0_i32_1 = arith.constant 0 : i32
    return %c0_i32, %c0_i32_0 : i32, i32
  }
  func.func @transform_10(%arg0: i32) -> (i32, i32) {
    %c0_i32 = arith.constant 0 : i32
    %c0_i32_0 = arith.constant 0 : i32
    return %arg0, %c0_i32 : i32, i32
  }
}

</mosaic_0001>

<bundles_post_ra>
// kernel: _critic_call.1
= control target key start
LH: loop header
LB: loop body
LE: loop exit
PB: predicated region body
PF: predicated region fallthrough
CT: control target
= control target key end

     0   :  { %15 = vsyncpa [#allocation3], 0  ;;  %s4883_s0 = inlined_call_operand.hbm [shape: bf16[16,128], index: 0, kind: input, shape index: {}]   ;;  %s4884_s1 = inlined_call_operand.hbm [shape: bf16[128,1024], index: 1, kind: input, shape index: {}]   ;;  %s4885_s2 = inlined_call_operand.hbm [shape: f32[1,1024], index: 2, kind: input, shape index: {}]   ;;  %s4886_s3 = inlined_call_operand.hbm [shape: bf16[512,384], index: 3, kind: input, shape index: {}]   ;;  %s4887_s4 = inlined_call_operand.vmem [shape: f32[1,384], index: 4, kind: input, shape index: {}]   ;;  %s4888_s5 = inlined_call_operand.hbm [shape: bf16[512,384], index: 5, kind: input, shape index: {}]   ;;  %s4889_s6 = inlined_call_operand.hbm [shape: f32[1,384], index: 6, kind: input, shape index: {}]   ;;  %s4890_s7 = inlined_call_operand.hbm [shape: bf16[384,128], index: 7, kind: input, shape index: {}]   ;;  %s4891_s8 = inlined_call_operand.hbm [shape: bf16[384,128], index: 8, kind: input, shape index: {}]   ;;  %s4892_s9 = inlined_call_operand.vmem [shape: f32[1,128], index: 9, kind: input, shape index: {}]   ;;  %s4893_s10 = inlined_call_operand.hbm [shape: f32[16,128], index: 10, kind: output, shape index: {}]  }
   0x1   :  { %16 = vsyncpa [#allocation6], 0 }
   0x2   :  { %17 = vsyncpa [#allocation9], 0 }
   0x3   :  { %18 = vsyncpa [#allocation12], 0 }
   0x4   :  { %19 = vsyncpa [#allocation15], 0  ;;  %s38_s15 = sshll.u32 %s4884_s1, 4  ;;  %s39_s15 = int_to_ptr.hbm [resolvable:$true] %s38_s15 }
   0x5   :  { %20 = vsyncpa [#allocation4], 0  ;;  %s4663_s16 = smov [#allocation5]   ;;  %s62_s20 = sshll.u32 %s4886_s3, 4  ;;  %s63_s20 = int_to_ptr.hbm [resolvable:$true] %s62_s20 }
   0x6   :  { %s40_s17 = sshll.u32 %s4663_s16, 4  ;;  %s4664_s21 = smov 512   ;;  %s41_s17 = int_to_ptr.vmem [resolvable:$true] %s40_s17 }
   0x7   :  { %s4665_s22 = smov 32   ;;  %s4666_s23 = smov [#allocation8]  }
   0x8   :  { %46 = dma.hbm_to_vmem [thread:$0]  %s39_s15, 8192, %s41_s17, [#allocation6], %s4664_s21, %s4664_s21, %s4665_s22  }
   0x9   :  { %s64_s24 = sshll.u32 %s4666_s23, 4  ;;  %s4667_s25 = smov 192   ;;  %s65_s24 = int_to_ptr.vmem [resolvable:$true] %s64_s24 }
   0xa   :  { %s4668_s26 = smov 12   ;;  %s91_s28 = sshll.u32 %s4889_s6, 4  ;;  %s92_s28 = int_to_ptr.hbm [resolvable:$true] %s91_s28 }
   0xb   :  { %70 = dma.hbm_to_vmem [thread:$0]  %s63_s20, 12288, %s65_s24, [#allocation9], %s4667_s25, %s4667_s25, %s4668_s26  }
   0xc   :  { %s4669_s29 = smov [#allocation11]   ;;  %s25_s12 = sshll.u32 %s4883_s0, 4  ;;  %s26_s12 = int_to_ptr.hbm [resolvable:$true] %s25_s12 }
   0xd   :  { %s93_s3 = sshll.u32 %s4669_s29, 4  ;;  %s4670_s13 = smov [#allocation2]   ;;  %s94_s3 = int_to_ptr.vmem [resolvable:$true] %s93_s3 }
   0xe   :  { %96 = dma.hbm_to_vmem [thread:$0]  %s92_s28, 48, %s94_s3, [#allocation12]  }
   0xf   :  { %s27_s14 = sshll.u32 %s4670_s13, 4  ;;  %s4671_s15 = smov 64   ;;  %s28_s14 = int_to_ptr.vmem [resolvable:$true] %s27_s14 }
  0x10   :  { %s4672_s16 = smov 4   ;;  %s52_s6 = sshll.u32 %s4885_s2, 4  ;;  %s53_s6 = int_to_ptr.hbm [resolvable:$true] %s52_s6 }
  0x11   :  { %33 = dma.hbm_to_vmem [thread:$0]  %s26_s12, 128, %s28_s14, [#allocation3], %s4671_s15, %s4671_s15, %s4672_s16  }
  0x12   :  { %s4673_s19 = smov [#allocation7]   ;;  %s77_s0 = sshll.u32 %s4888_s5, 4  ;;  %s78_s0 = int_to_ptr.hbm [resolvable:$true] %s77_s0 }
  0x13   :  { %s54_s20 = sshll.u32 %s4673_s19, 4  ;;  %s4674_s23 = smov [#allocation10]   ;;  %s55_s20 = int_to_ptr.vmem [resolvable:$true] %s54_s20 }
  0x14   :  { %57 = dma.hbm_to_vmem [thread:$0]  %s53_s6, 128, %s55_s20, [#allocation6]  }
  0x15   :  { %s79_s24 = sshll.u32 %s4674_s23, 4  ;;  %s101_s28 = sshll.u32 %s4890_s7, 4  ;;  %s80_s24 = int_to_ptr.vmem [resolvable:$true] %s79_s24  ;;  %s102_s28 = int_to_ptr.hbm [resolvable:$true] %s101_s28 }
  0x16   :  { %85 = dma.hbm_to_vmem [thread:$0]  %s78_s0, 12288, %s80_s24, [#allocation9], %s4667_s25, %s4667_s25, %s4668_s26  }
  0x17   :  { %s114_s3 = sshll.u32 %s4891_s8, 4  ;;  %s4675_s30 = smov [#allocation13]   ;;  %s115_s3 = int_to_ptr.hbm [resolvable:$true] %s114_s3 }
  0x18   :  { %s103_s5 = sshll.u32 %s4675_s30, 4  ;;  %s4676_s11 = smov [#allocation14]   ;;  %s104_s5 = int_to_ptr.vmem [resolvable:$true] %s103_s5 }
  0x19   :  { %109 = dma.hbm_to_vmem [thread:$0]  %s102_s28, 3072, %s104_s5, [#allocation12], %s4671_s15, %s4671_s15, %s4672_s16  }
  0x1a   :  { %s116_s12 = sshll.u32 %s4676_s11, 4  ;;  %s117_s12 = int_to_ptr.vmem [resolvable:$true] %s116_s12 }
  0x1b   :  { %122 = dma.hbm_to_vmem [thread:$0]  %s115_s3, 3072, %s117_s12, [#allocation15], %s4671_s15, %s4671_s15, %s4672_s16  }
  0x1c   :  { %4651 = dma.done.wait [#allocation3], 128  }
  0x1d   :  { %4652 = vsyncadd [#allocation3], 4294967168 }
  0x1e   :  { %4653 = dma.done.wait [#allocation6], 8320  }
  0x1f   :  { %4654 = vsyncadd [#allocation6], 4294958976 }
  0x20   :  { %4655 = dma.done.wait [#allocation9], 24576  }
  0x21   :  { %4656 = vsyncadd [#allocation9], 4294942720 }
  0x22   :  { %4657 = dma.done.wait [#allocation12], 3120  }
  0x23   :  { %4658 = vsyncadd [#allocation12], 4294964176 }
  0x24   :  { %4659 = dma.done.wait [#allocation15], 3072  }
  0x25   :  { %4660 = vsyncadd [#allocation15], 4294964224  ;;  %v3122_v0 = vld [vmem:[#allocation5 + $0x1c0] sm:$0xf]  ;;  %v4169_v2 = vld [vmem:[#allocation5 + $0x1c4] sm:$0xf] }
  0x26   :  { %v4173_v1 = vld [vmem:[#allocation5 + $0x1dc] sm:$0xf0]  ;;  %v3124_v4 = vld [vmem:[#allocation5 + $0x1e0] sm:$0xf0]  ;;  %v3130_v5 = vld [vmem:[#allocation5 + $0x1c8] sm:$0xf] }
  0x27   :  { %v3123_v3 = vor.u32 %v4173_v1, %v3122_v0  ;;  %v4174_v6 = vld [vmem:[#allocation5 + $0x1e4] sm:$0xf0]  ;;  %v3127_v7 = vor.u32 %v4169_v2, %v3124_v4  ;;  %v4170_v9 = vld [vmem:[#allocation5 + $0x1cc] sm:$0xf]  ;;  %v3090_v11 = vld [vmem:[#allocation5 + $0x180] sm:$0xf] }
  0x28   :  { %v3131_v8 = vor.u32 %v4174_v6, %v3130_v5  ;;  %v3132_v10 = vld [vmem:[#allocation5 + $0x1e8] sm:$0xf0]  ;;  %v4165_v13 = vld [vmem:[#allocation5 + $0x19c] sm:$0xf0]  ;;  %v4161_v14 = vld [vmem:[#allocation5 + $0x184] sm:$0xf] }
  0x29   :  { %567 = vmatpush.bf16.msra.mxu0 %v3123_v3  ;;  %v3135_v12 = vor.u32 %v4170_v9, %v3132_v10  ;;  %v3092_v15 = vld [vmem:[#allocation5 + $0x1a0] sm:$0xf0]  ;;  %581 = vmatpush.bf16.msra.mxu1 %v3127_v7  ;;  %v3091_v16 = vor.u32 %v4165_v13, %v3090_v11  ;;  %v3098_v18 = vld [vmem:[#allocation5 + $0x188] sm:$0xf]  ;;  %v4162_v20 = vld [vmem:[#allocation5 + $0x18c] sm:$0xf] }
  0x2a   :  { %595 = vmatpush.bf16.msra.mxu2 %v3131_v8  ;;  %v3095_v17 = vor.u32 %v4161_v14, %v3092_v15  ;;  %v4166_v19 = vld [vmem:[#allocation5 + $0x1a4] sm:$0xf0]  ;;  %v3100_v22 = vld [vmem:[#allocation5 + $0x1a8] sm:$0xf0]  ;;  %v3058_v23 = vld [vmem:[#allocation5 + $0x140] sm:$0xf] }
  0x2b   :  { %609 = vmatpush.bf16.msra.mxu3 %v3135_v12  ;;  %v3099_v21 = vor.u32 %v4166_v19, %v3098_v18  ;;  %v4157_v24 = vld [vmem:[#allocation5 + $0x15c] sm:$0xf0]  ;;  %v3103_v25 = vor.u32 %v4162_v20, %v3100_v22  ;;  %v4153_v26 = vld [vmem:[#allocation5 + $0x144] sm:$0xf]  ;;  %v3066_v28 = vld [vmem:[#allocation5 + $0x148] sm:$0xf] }
  0x2c   :  { %v3060_v27 = vld [vmem:[#allocation5 + $0x160] sm:$0xf0]  ;;  %v3059_v29 = vor.u32 %v4157_v24, %v3058_v23  ;;  %v4158_v30 = vld [vmem:[#allocation5 + $0x164] sm:$0xf0]  ;;  %v4154_v31 = vld [vmem:[#allocation5 + $0x14c] sm:$0xf] }
  0x2d   :  { %568 = vmatpush.bf16.msra.mxu0 %v3091_v16  ;;  %v3068_v32 = vld [vmem:[#allocation5 + $0x168] sm:$0xf0]  ;;  %582 = vmatpush.bf16.msra.mxu1 %v3095_v17  ;;  %v3063_v33 = vor.u32 %v4153_v26, %v3060_v27  ;;  %v3067_v34 = vor.u32 %v4158_v30, %v3066_v28  ;;  %v3026_v35 = vld [vmem:[#allocation5 + $0x100] sm:$0xf]  ;;  %v4145_v37 = vld [vmem:[#allocation5 + $0x104] sm:$0xf] }
  0x2e   :  { %596 = vmatpush.bf16.msra.mxu2 %v3099_v21  ;;  %v4149_v36 = vld [vmem:[#allocation5 + $0x11c] sm:$0xf0]  ;;  %v3071_v38 = vor.u32 %v4154_v31, %v3068_v32  ;;  %v3028_v39 = vld [vmem:[#allocation5 + $0x120] sm:$0xf0]  ;;  %v3034_v40 = vld [vmem:[#allocation5 + $0x108] sm:$0xf] }
  0x2f   :  { %610 = vmatpush.bf16.msra.mxu3 %v3103_v25  ;;  %v4150_v41 = vld [vmem:[#allocation5 + $0x124] sm:$0xf0]  ;;  %v4146_v42 = vld [vmem:[#allocation5 + $0x10c] sm:$0xf]  ;;  %v3027_v44 = vor.u32 %v4149_v36, %v3026_v35  ;;  %v3031_v45 = vor.u32 %v4145_v37, %v3028_v39  ;;  %v2994_v47 = vld [vmem:[#allocation5 + $0xc0] sm:$0xf] }
  0x30   :  { %v3036_v43 = vld [vmem:[#allocation5 + $0x128] sm:$0xf0]  ;;  %v3035_v46 = vor.u32 %v4150_v41, %v3034_v40  ;;  %v4141_v48 = vld [vmem:[#allocation5 + $0xdc] sm:$0xf0]  ;;  %v4137_v49 = vld [vmem:[#allocation5 + $0xc4] sm:$0xf] }
  0x31   :  { %569 = vmatpush.bf16.msra.mxu0 %v3059_v29  ;;  %583 = vmatpush.bf16.msra.mxu1 %v3063_v33  ;;  %v3039_v50 = vor.u32 %v4146_v42, %v3036_v43  ;;  %v2996_v51 = vld [vmem:[#allocation5 + $0xe0] sm:$0xf0]  ;;  %v3002_v52 = vld [vmem:[#allocation5 + $0xc8] sm:$0xf]  ;;  %v4138_v54 = vld [vmem:[#allocation5 + $0xcc] sm:$0xf]  ;;  %v2995_v56 = vor.u32 %v4141_v48, %v2994_v47 }
  0x32   :  { %597 = vmatpush.bf16.msra.mxu2 %v3067_v34  ;;  %v4142_v53 = vld [vmem:[#allocation5 + $0xe4] sm:$0xf0]  ;;  %v3004_v55 = vld [vmem:[#allocation5 + $0xe8] sm:$0xf0]  ;;  %v2999_v57 = vor.u32 %v4137_v49, %v2996_v51  ;;  %v2962_v59 = vld [vmem:[#allocation5 + $0x80] sm:$0xf] }
  0x33   :  { %611 = vmatpush.bf16.msra.mxu3 %v3071_v38  ;;  %v3003_v58 = vor.u32 %v4142_v53, %v3002_v52  ;;  %v4133_v60 = vld [vmem:[#allocation5 + $0x9c] sm:$0xf0]  ;;  %v4129_v61 = vld [vmem:[#allocation5 + $0x84] sm:$0xf]  ;;  %v3007_v62 = vor.u32 %v4138_v54, %v3004_v55  ;;  %v2970_v0 = vld [vmem:[#allocation5 + $0x88] sm:$0xf] }
  0x34   :  { %v2964_v63 = vld [vmem:[#allocation5 + $0xa0] sm:$0xf0]  ;;  %v4134_v1 = vld [vmem:[#allocation5 + $0xa4] sm:$0xf0]  ;;  %v4130_v2 = vld [vmem:[#allocation5 + $0x8c] sm:$0xf]  ;;  %v2963_v4 = vor.u32 %v4133_v60, %v2962_v59 }
  0x35   :  { %570 = vmatpush.bf16.msra.mxu0 %v3027_v44  ;;  %584 = vmatpush.bf16.msra.mxu1 %v3031_v45  ;;  %v2972_v3 = vld [vmem:[#allocation5 + $0xa8] sm:$0xf0]  ;;  %v2967_v5 = vor.u32 %v4129_v61, %v2964_v63  ;;  %v2971_v6 = vor.u32 %v4134_v1, %v2970_v0  ;;  %v2930_v7 = vld [vmem:[#allocation5 + $0x40] sm:$0xf]  ;;  %v4121_v9 = vld [vmem:[#allocation5 + $0x44] sm:$0xf] }
  0x36   :  { %598 = vmatpush.bf16.msra.mxu2 %v3035_v46  ;;  %v4125_v8 = vld [vmem:[#allocation5 + $0x5c] sm:$0xf0]  ;;  %v2975_v10 = vor.u32 %v4130_v2, %v2972_v3  ;;  %v2932_v11 = vld [vmem:[#allocation5 + $0x60] sm:$0xf0]  ;;  %v2938_v12 = vld [vmem:[#allocation5 + $0x48] sm:$0xf] }
  0x37   :  { %612 = vmatpush.bf16.msra.mxu3 %v3039_v50  ;;  %v4126_v13 = vld [vmem:[#allocation5 + $0x64] sm:$0xf0]  ;;  %v4122_v14 = vld [vmem:[#allocation5 + $0x4c] sm:$0xf]  ;;  %v2931_v16 = vor.u32 %v4125_v8, %v2930_v7  ;;  %v2898_v17 = vld [vmem:[#allocation5] sm:$0xf]  ;;  %v2935_v18 = vor.u32 %v4121_v9, %v2932_v11 }
  0x38   :  { %v2940_v15 = vld [vmem:[#allocation5 + $0x68] sm:$0xf0]  ;;  %v2939_v19 = vor.u32 %v4126_v13, %v2938_v12  ;;  %v4117_v20 = vld [vmem:[#allocation5 + $0x1c] sm:$0xf0]  ;;  %v4113_v21 = vld [vmem:[#allocation5 + $0x4] sm:$0xf] }
  0x39   :  { %571 = vmatpush.bf16.msra.mxu0 %v2995_v56  ;;  %585 = vmatpush.bf16.msra.mxu1 %v2999_v57  ;;  %v2900_v22 = vld [vmem:[#allocation5 + $0x20] sm:$0xf0]  ;;  %v2943_v23 = vor.u32 %v4122_v14, %v2940_v15  ;;  %v2906_v24 = vld [vmem:[#allocation5 + $0x8] sm:$0xf]  ;;  %v4114_v26 = vld [vmem:[#allocation5 + $0xc] sm:$0xf]  ;;  %v2899_v30 = vor.u32 %v4117_v20, %v2898_v17 }
  0x3a   :  { %599 = vmatpush.bf16.msra.mxu2 %v3003_v58  ;;  %v4118_v25 = vld [vmem:[#allocation5 + $0x24] sm:$0xf0]  ;;  %v2908_v27 = vld [vmem:[#allocation5 + $0x28] sm:$0xf0]  ;;  %v3146_v28 = vld [vmem:[#allocation5 + $0x1d8] sm:$0xf]  ;;  %v2903_v33 = vor.u32 %v4113_v21, %v2900_v22 }
  0x3b   :  { %613 = vmatpush.bf16.msra.mxu3 %v3007_v62  ;;  %v4176_v29 = vld [vmem:[#allocation5 + $0x1f4] sm:$0xf0]  ;;  %v4172_v31 = vld [vmem:[#allocation5 + $0x1dc] sm:$0xf]  ;;  %v2907_v34 = vor.u32 %v4118_v25, %v2906_v24  ;;  %v2911_v36 = vor.u32 %v4114_v26, %v2908_v27  ;;  %v3138_v39 = vld [vmem:[#allocation5 + $0x1d0] sm:$0xf] }
  0x3c   :  { %v3148_v32 = vld [vmem:[#allocation5 + $0x1f8] sm:$0xf0]  ;;  %v3147_v37 = vor.u32 %v4176_v29, %v3146_v28  ;;  %v3114_v38 = vld [vmem:[#allocation5 + $0x198] sm:$0xf]  ;;  %v4175_v40 = vld [vmem:[#allocation5 + $0x1ec] sm:$0xf0] }
  0x3d   :  { %572 = vmatpush.bf16.msra.mxu0 %v2963_v4  ;;  %586 = vmatpush.bf16.msra.mxu1 %v2967_v5  ;;  %v4765_v35 = vld [vmem:[#allocation2] sm:$0xff]  ;;  %v3151_v41 = vor.u32 %v4172_v31, %v3148_v32  ;;  %v4171_v43 = vld [vmem:[#allocation5 + $0x1d4] sm:$0xf]  ;;  %v3139_v47 = vor.u32 %v4175_v40, %v3138_v39  ;;  %v3106_v51 = vld [vmem:[#allocation5 + $0x190] sm:$0xf]  ;;  %s4677_s26 = smov [#allocation16]  }
  0x3e   :  { %600 = vmatpush.bf16.msra.mxu2 %v2971_v6  ;;  %v4168_v42 = vld [vmem:[#allocation5 + $0x1b4] sm:$0xf0]  ;;  %v3140_v44 = vld [vmem:[#allocation5 + $0x1f0] sm:$0xf0]  ;;  %v4164_v45 = vld [vmem:[#allocation5 + $0x19c] sm:$0xf] }
  0x3f   :  { %614 = vmatpush.bf16.msra.mxu3 %v2975_v10  ;;  %v3116_v46 = vld [vmem:[#allocation5 + $0x1b8] sm:$0xf0]  ;;  %v3115_v48 = vor.u32 %v4168_v42, %v3114_v38  ;;  %v3143_v49 = vor.u32 %v4171_v43, %v3140_v44  ;;  %v3082_v50 = vld [vmem:[#allocation5 + $0x158] sm:$0xf]  ;;  %v4167_v52 = vld [vmem:[#allocation5 + $0x1ac] sm:$0xf0] }
  0x40   :  { %v3119_v53 = vor.u32 %v4164_v45, %v3116_v46  ;;  %v4160_v54 = vld [vmem:[#allocation5 + $0x174] sm:$0xf0]  ;;  %v4163_v55 = vld [vmem:[#allocation5 + $0x194] sm:$0xf]  ;;  %v4156_v57 = vld [vmem:[#allocation5 + $0x15c] sm:$0xf]  ;;  %v3107_v59 = vor.u32 %v4167_v52, %v3106_v51 }
  0x41   :  { %573 = vmatpush.bf16.msra.mxu0 %v2931_v16  ;;  %587 = vmatpush.bf16.msra.mxu1 %v2935_v18  ;;  %v3108_v56 = vld [vmem:[#allocation5 + $0x1b0] sm:$0xf0]  ;;  %v3084_v58 = vld [vmem:[#allocation5 + $0x178] sm:$0xf0]  ;;  %v3083_v60 = vor.u32 %v4160_v54, %v3082_v50  ;;  %v3050_v62 = vld [vmem:[#allocation5 + $0x118] sm:$0xf] }
  0x42   :  { %601 = vmatpush.bf16.msra.mxu2 %v2939_v19  ;;  %v3111_v61 = vor.u32 %v4163_v55, %v3108_v56  ;;  %v3074_v63 = vld [vmem:[#allocation5 + $0x150] sm:$0xf]  ;;  %v3087_v1 = vor.u32 %v4156_v57, %v3084_v58  ;;  %v4152_v2 = vld [vmem:[#allocation5 + $0x134] sm:$0xf0]  ;;  %v4155_v3 = vld [vmem:[#allocation5 + $0x154] sm:$0xf] }
  0x43   :  { %615 = vmatpush.bf16.msra.mxu3 %v2943_v23  ;;  %v4159_v0 = vld [vmem:[#allocation5 + $0x16c] sm:$0xf0]  ;;  %v3076_v4 = vld [vmem:[#allocation5 + $0x170] sm:$0xf0]  ;;  %v4148_v5 = vld [vmem:[#allocation5 + $0x11c] sm:$0xf]  ;;  %v3051_v8 = vor.u32 %v4152_v2, %v3050_v62 }
  0x44   :  { %v3052_v6 = vld [vmem:[#allocation5 + $0x138] sm:$0xf0]  ;;  %v3075_v7 = vor.u32 %v4159_v0, %v3074_v63  ;;  %v3079_v9 = vor.u32 %v4155_v3, %v3076_v4  ;;  %v3018_v10 = vld [vmem:[#allocation5 + $0xd8] sm:$0xf]  ;;  %v3042_v11 = vld [vmem:[#allocation5 + $0x110] sm:$0xf] }
  0x45   :  { %574 = vmatpush.bf16.msra.mxu0 %v2899_v30  ;;  %588 = vmatpush.bf16.msra.mxu1 %v2903_v33  ;;  %v4151_v12 = vld [vmem:[#allocation5 + $0x12c] sm:$0xf0]  ;;  %v3055_v13 = vor.u32 %v4148_v5, %v3052_v6  ;;  %v4144_v14 = vld [vmem:[#allocation5 + $0xf4] sm:$0xf0]  ;;  %v4147_v15 = vld [vmem:[#allocation5 + $0x114] sm:$0xf] }
  0x46   :  { %602 = vmatpush.bf16.msra.mxu2 %v2907_v34  ;;  %v3044_v16 = vld [vmem:[#allocation5 + $0x130] sm:$0xf0]  ;;  %v4140_v17 = vld [vmem:[#allocation5 + $0xdc] sm:$0xf]  ;;  %v3043_v19 = vor.u32 %v4151_v12, %v3042_v11  ;;  %v3019_v20 = vor.u32 %v4144_v14, %v3018_v10  ;;  %v2986_v22 = vld [vmem:[#allocation5 + $0x98] sm:$0xf] }
  0x47   :  { %616 = vmatpush.bf16.msra.mxu3 %v2911_v36  ;;  %v3020_v18 = vld [vmem:[#allocation5 + $0xf8] sm:$0xf0]  ;;  %v3047_v21 = vor.u32 %v4147_v15, %v3044_v16  ;;  %v3010_v23 = vld [vmem:[#allocation5 + $0xd0] sm:$0xf]  ;;  %v4136_v26 = vld [vmem:[#allocation5 + $0xb4] sm:$0xf0] }
  0x48   :  { %575 = vmatmul.bf16.vlgmr.msra.gmra.mxu0 %v4765_v35  ;;  %589 = vmatmul.bf16.vlgmr.msra.gmra.mxu1 %v4765_v35  ;;  %v4143_v24 = vld [vmem:[#allocation5 + $0xec] sm:$0xf0]  ;;  %v3023_v25 = vor.u32 %v4140_v17, %v3020_v18  ;;  %v4139_v27 = vld [vmem:[#allocation5 + $0xd4] sm:$0xf]  ;;  %v4132_v29 = vld [vmem:[#allocation5 + $0x9c] sm:$0xf]  ;;  %v2987_v32 = vor.u32 %v4136_v26, %v2986_v22 }
  0x49   :  { %603 = vmatmul.bf16.vlgmr.msra.gmra.mxu2 %v4765_v35  ;;  %623 = vmatpush.bf16.msrb.mxu0 %v3139_v47  ;;  %v3012_v28 = vld [vmem:[#allocation5 + $0xf0] sm:$0xf0]  ;;  %v2988_v30 = vld [vmem:[#allocation5 + $0xb8] sm:$0xf0]  ;;  %v3011_v31 = vor.u32 %v4143_v24, %v3010_v23  ;;  %v2954_v34 = vld [vmem:[#allocation5 + $0x58] sm:$0xf] }
  0x4a   :  { %651 = vmatpush.bf16.msrb.mxu2 %v3147_v37  ;;  %617 = vmatmul.bf16.vlgmr.msra.gmra.mxu3 %v4765_v35  ;;  %v3015_v33 = vor.u32 %v4139_v27, %v3012_v28  ;;  %v2978_v36 = vld [vmem:[#allocation5 + $0x90] sm:$0xf]  ;;  %v2991_v38 = vor.u32 %v4132_v29, %v2988_v30  ;;  %v4128_v39 = vld [vmem:[#allocation5 + $0x74] sm:$0xf0]  ;;  %v4131_v40 = vld [vmem:[#allocation5 + $0x94] sm:$0xf] }
  0x4b   :  { %665 = vmatpush.bf16.msrb.mxu3 %v3151_v41  ;;  %637 = vmatpush.bf16.msrb.mxu1 %v3143_v49  ;;  %v4135_v37 = vld [vmem:[#allocation5 + $0xac] sm:$0xf0]  ;;  %v2980_v41 = vld [vmem:[#allocation5 + $0xb0] sm:$0xf0]  ;;  %v4124_v42 = vld [vmem:[#allocation5 + $0x5c] sm:$0xf]  ;;  %v2955_v46 = vor.u32 %v4128_v39, %v2954_v34 }
  0x4c   :  { %v2956_v43 = vld [vmem:[#allocation5 + $0x78] sm:$0xf0]  ;;  %v2979_v44 = vor.u32 %v4135_v37, %v2978_v36  ;;  %v2922_v45 = vld [vmem:[#allocation5 + $0x18] sm:$0xf]  ;;  %v2983_v47 = vor.u32 %v4131_v40, %v2980_v41  ;;  %v2946_v49 = vld [vmem:[#allocation5 + $0x50] sm:$0xf] }
  0x4d   :  { %624 = vmatpush.bf16.msrb.mxu0 %v3107_v59  ;;  %v4127_v50 = vld [vmem:[#allocation5 + $0x6c] sm:$0xf0]  ;;  %v2959_v51 = vor.u32 %v4124_v42, %v2956_v43  ;;  %v4116_v52 = vld [vmem:[#allocation5 + $0x1c] sm:$0xf]  ;;  %v2948_v54 = vld [vmem:[#allocation5 + $0x70] sm:$0xf0] }
  0x4e   :  { %652 = vmatpush.bf16.msrb.mxu2 %v3115_v48  ;;  %v4120_v48 = vld [vmem:[#allocation5 + $0x34] sm:$0xf0]  ;;  %v2924_v55 = vld [vmem:[#allocation5 + $0x38] sm:$0xf0]  ;;  %v3430_v56 = vld [vmem:[#allocation8 + $0x228] sm:$0xf]  ;;  %v2947_v58 = vor.u32 %v4127_v50, %v2946_v49 }
  0x4f   :  { %666 = vmatpush.bf16.msrb.mxu3 %v3119_v53  ;;  %638 = vmatpush.bf16.msrb.mxu1 %v3111_v61  ;;  %v4123_v53 = vld [vmem:[#allocation5 + $0x54] sm:$0xf]  ;;  %v4247_v57 = vld [vmem:[#allocation8 + $0x230] sm:$0xf0]  ;;  %v3526_v59 = vld [vmem:[#allocation8 + $0x2e8] sm:$0xf]  ;;  %v2923_v61 = vor.u32 %v4120_v48, %v2922_v45 }
  0x50   :  { %v2951_v62 = vor.u32 %v4123_v53, %v2948_v54  ;;  %v2914_v63 = vld [vmem:[#allocation5 + $0x10] sm:$0xf]  ;;  %v4115_v2 = vld [vmem:[#allocation5 + $0x14] sm:$0xf]  ;;  %v3431_v5 = vor.u32 %v4247_v57, %v3430_v56  ;;  %v4199_v6 = vld [vmem:[#allocation8 + $0xb0] sm:$0xf0] }
  0x51   :  { %625 = vmatpush.bf16.msrb.mxu0 %v3075_v7  ;;  %v4119_v0 = vld [vmem:[#allocation5 + $0x2c] sm:$0xf0]  ;;  %v2916_v3 = vld [vmem:[#allocation5 + $0x30] sm:$0xf0]  ;;  %v3418_v11 = vld [vmem:[#allocation8 + $0x210] sm:$0xf] }
  0x52   :  { %653 = vmatpush.bf16.msrb.mxu2 %v3083_v60  ;;  %v4271_v60 = vld [vmem:[#allocation8 + $0x2f0] sm:$0xf0]  ;;  %v3238_v4 = vld [vmem:[#allocation8 + $0xa8] sm:$0xf]  ;;  %v2915_v10 = vor.u32 %v4119_v0, %v2914_v63  ;;  %v4244_v12 = vld [vmem:[#allocation8 + $0x218] sm:$0xf0] }
  0x53   :  { %667 = vmatpush.bf16.msrb.mxu3 %v3087_v1  ;;  %639 = vmatpush.bf16.msrb.mxu1 %v3079_v9  ;;  %v2927_v1 = vor.u32 %v4116_v52, %v2924_v55  ;;  %v3334_v7 = vld [vmem:[#allocation8 + $0x168] sm:$0xf]  ;;  %v3527_v9 = vor.u32 %v4271_v60, %v3526_v59  ;;  %v3514_v14 = vld [vmem:[#allocation8 + $0x2d0] sm:$0xf]  ;;  %v4268_v15 = vld [vmem:[#allocation8 + $0x2d8] sm:$0xf0]  ;;  %v3239_v16 = vor.u32 %v4199_v6, %v3238_v4 }
  0x54   :  { %v3226_v18 = vld [vmem:[#allocation8 + $0x90] sm:$0xf]  ;;  %v3419_v22 = vor.u32 %v4244_v12, %v3418_v11  ;;  %v3515_v23 = vor.u32 %v4268_v15, %v3514_v14  ;;  %v3406_v24 = vld [vmem:[#allocation8 + $0x1f8] sm:$0xf]  ;;  %v4265_v27 = vld [vmem:[#allocation8 + $0x2c0] sm:$0xf0] }
  0x55   :  { %626 = vmatpush.bf16.msrb.mxu0 %v3043_v19  ;;  %v4196_v19 = vld [vmem:[#allocation8 + $0x98] sm:$0xf0]  ;;  %v3502_v26 = vld [vmem:[#allocation8 + $0x2b8] sm:$0xf]  ;;  %v3394_v37 = vld [vmem:[#allocation8 + $0x1e0] sm:$0xf] }
  0x56   :  { %654 = vmatpush.bf16.msrb.mxu2 %v3051_v8  ;;  %v4223_v8 = vld [vmem:[#allocation8 + $0x170] sm:$0xf0]  ;;  %v3227_v28 = vor.u32 %v4196_v19, %v3226_v18  ;;  %v3214_v30 = vld [vmem:[#allocation8 + $0x78] sm:$0xf]  ;;  %v3503_v36 = vor.u32 %v4265_v27, %v3502_v26  ;;  %v3490_v39 = vld [vmem:[#allocation8 + $0x2a0] sm:$0xf] }
  0x57   :  { %668 = vmatpush.bf16.msrb.mxu3 %v3055_v13  ;;  %640 = vmatpush.bf16.msrb.mxu1 %v3047_v21  ;;  %v2919_v13 = vor.u32 %v4115_v2, %v2916_v3  ;;  %v3335_v17 = vor.u32 %v4223_v8, %v3334_v7  ;;  %v4220_v21 = vld [vmem:[#allocation8 + $0x158] sm:$0xf0]  ;;  %v4262_v40 = vld [vmem:[#allocation8 + $0x2a8] sm:$0xf0]  ;;  %v3202_v43 = vld [vmem:[#allocation8 + $0x60] sm:$0xf] }
  0x58   :  { %v3298_v45 = vld [vmem:[#allocation8 + $0x120] sm:$0xf]  ;;  %v3491_v48 = vor.u32 %v4262_v40, %v3490_v39  ;;  %v3382_v49 = vld [vmem:[#allocation8 + $0x1c8] sm:$0xf]  ;;  %v4187_v55 = vld [vmem:[#allocation8 + $0x50] sm:$0xf0] }
  0x59   :  { %627 = vmatpush.bf16.msrb.mxu0 %v3011_v31  ;;  %v4193_v31 = vld [vmem:[#allocation8 + $0x80] sm:$0xf0]  ;;  %v3478_v50 = vld [vmem:[#allocation8 + $0x288] sm:$0xf]  ;;  %v4211_v57 = vld [vmem:[#allocation8 + $0x110] sm:$0xf0] }
  0x5a   :  { %655 = vmatpush.bf16.msrb.mxu2 %v3019_v20  ;;  %v3322_v20 = vld [vmem:[#allocation8 + $0x150] sm:$0xf]  ;;  %v3215_v41 = vor.u32 %v4193_v31, %v3214_v30  ;;  %v3190_v54 = vld [vmem:[#allocation8 + $0x48] sm:$0xf]  ;;  %v4256_v63 = vld [vmem:[#allocation8 + $0x278] sm:$0xf0] }
  0x5b   :  { %669 = vmatpush.bf16.msrb.mxu3 %v3023_v25  ;;  %641 = vmatpush.bf16.msrb.mxu1 %v3015_v33  ;;  %v4241_v25 = vld [vmem:[#allocation8 + $0x200] sm:$0xf0]  ;;  %v3323_v29 = vor.u32 %v4220_v21, %v3322_v20  ;;  %v3286_v56 = vld [vmem:[#allocation8 + $0x108] sm:$0xf]  ;;  %v3370_v60 = vld [vmem:[#allocation8 + $0x1b0] sm:$0xf]  ;;  %v3191_v0 = vor.u32 %v4187_v55, %v3190_v54 }
  0x5c   :  { %v4217_v33 = vld [vmem:[#allocation8 + $0x140] sm:$0xf0]  ;;  %v3407_v34 = vor.u32 %v4241_v25, %v3406_v24  ;;  %v3178_v2 = vld [vmem:[#allocation8 + $0x30] sm:$0xf]  ;;  %v4184_v3 = vld [vmem:[#allocation8 + $0x38] sm:$0xf0] }
  0x5d   :  { %628 = vmatpush.bf16.msrb.mxu0 %v2979_v44  ;;  %v4190_v44 = vld [vmem:[#allocation8 + $0x68] sm:$0xf0]  ;;  %v3274_v4 = vld [vmem:[#allocation8 + $0xf0] sm:$0xf]  ;;  %v3358_v8 = vld [vmem:[#allocation8 + $0x198] sm:$0xf]  ;;  %v3179_v12 = vor.u32 %v4184_v3, %v3178_v2 }
  0x5e   :  { %656 = vmatpush.bf16.msrb.mxu2 %v2987_v32  ;;  %v3310_v32 = vld [vmem:[#allocation8 + $0x138] sm:$0xf]  ;;  %v3203_v52 = vor.u32 %v4190_v44, %v3202_v43  ;;  %v4253_v11 = vld [vmem:[#allocation8 + $0x260] sm:$0xf0]  ;;  %v3346_v20 = vld [vmem:[#allocation8 + $0x180] sm:$0xf] }
  0x5f   :  { %670 = vmatpush.bf16.msrb.mxu3 %v2991_v38  ;;  %642 = vmatpush.bf16.msrb.mxu1 %v2983_v47  ;;  %v4238_v38 = vld [vmem:[#allocation8 + $0x1e8] sm:$0xf0]  ;;  %v3311_v42 = vor.u32 %v4217_v33, %v3310_v32  ;;  %v3166_v14 = vld [vmem:[#allocation8 + $0x18] sm:$0xf]  ;;  %v4181_v15 = vld [vmem:[#allocation8 + $0x20] sm:$0xf0] }
  0x60   :  { %v3395_v47 = vor.u32 %v4238_v38, %v3394_v37  ;;  %v4226_v21 = vld [vmem:[#allocation8 + $0x188] sm:$0xf0]  ;;  %v3432_v26 = vld [vmem:[#allocation8 + $0x234] sm:$0xf0]  ;;  %v3167_v27 = vor.u32 %v4181_v15, %v3166_v14  ;;  %v3250_v32 = vld [vmem:[#allocation8 + $0xc0] sm:$0xf] }
  0x61   :  { %629 = vmatpush.bf16.msrb.mxu0 %v2947_v58  ;;  %v4250_v24 = vld [vmem:[#allocation8 + $0x248] sm:$0xf0]  ;;  %v3528_v31 = vld [vmem:[#allocation8 + $0x2f4] sm:$0xf0]  ;;  %v4216_v54 = vld [vmem:[#allocation8 + $0x13c] sm:$0xf] }
  0x62   :  { %657 = vmatpush.bf16.msrb.mxu2 %v2955_v46  ;;  %v4214_v46 = vld [vmem:[#allocation8 + $0x128] sm:$0xf0]  ;;  %v3240_v37 = vld [vmem:[#allocation8 + $0xb4] sm:$0xf0]  ;;  %v3312_v55 = vld [vmem:[#allocation8 + $0x144] sm:$0xf0] }
  0x63   :  { %671 = vmatpush.bf16.msrb.mxu3 %v2959_v51  ;;  %643 = vmatpush.bf16.msrb.mxu1 %v2951_v62  ;;  %v4259_v51 = vld [vmem:[#allocation8 + $0x290] sm:$0xf0]  ;;  %v3299_v53 = vor.u32 %v4214_v46, %v3298_v45  ;;  %v3466_v62 = vld [vmem:[#allocation8 + $0x270] sm:$0xf]  ;;  %v4246_v25 = vld [vmem:[#allocation8 + $0x22c] sm:$0xf] }
  0x64   :  { %v3479_v59 = vor.u32 %v4259_v51, %v3478_v50  ;;  %v3467_v7 = vor.u32 %v4256_v63, %v3466_v62  ;;  %v4270_v30 = vld [vmem:[#allocation8 + $0x2ec] sm:$0xf]  ;;  %v3336_v39 = vld [vmem:[#allocation8 + $0x174] sm:$0xf0]  ;;  %v3516_v62 = vld [vmem:[#allocation8 + $0x2dc] sm:$0xf0] }
  0x65   :  { %630 = vmatpush.bf16.msrb.mxu0 %v2915_v10  ;;  %v3454_v10 = vld [vmem:[#allocation8 + $0x258] sm:$0xf]  ;;  %v4202_v33 = vld [vmem:[#allocation8 + $0xc8] sm:$0xf0]  ;;  %v4213_v2 = vld [vmem:[#allocation8 + $0x124] sm:$0xf] }
  0x66   :  { %658 = vmatpush.bf16.msrb.mxu2 %v2923_v61  ;;  %v4232_v61 = vld [vmem:[#allocation8 + $0x1b8] sm:$0xf0]  ;;  %v3455_v19 = vor.u32 %v4253_v11, %v3454_v10  ;;  %v4222_v38 = vld [vmem:[#allocation8 + $0x16c] sm:$0xf]  ;;  %v3251_v44 = vor.u32 %v4202_v33, %v3250_v32  ;;  %v3504_v10 = vld [vmem:[#allocation8 + $0x2c4] sm:$0xf0] }
  0x67   :  { %672 = vmatpush.bf16.msrb.mxu3 %v2927_v1  ;;  %644 = vmatpush.bf16.msrb.mxu1 %v2919_v13  ;;  %v3287_v1 = vor.u32 %v4211_v57, %v3286_v56  ;;  %v3371_v6 = vor.u32 %v4232_v61, %v3370_v60  ;;  %v3339_v46 = vor.u32 %v4222_v38, %v3336_v39  ;;  %v4267_v60 = vld [vmem:[#allocation8 + $0x2d4] sm:$0xf]  ;;  %v4210_v14 = vld [vmem:[#allocation8 + $0x10c] sm:$0xf]  ;;  %v3168_v38 = vld [vmem:[#allocation8 + $0x24] sm:$0xf0] }
  0x68   :  { %631 = vmatmul.bf16.vlgmr.msrb.gmra.mxu0 %v4765_v35  ;;  %v3315_v57 = vor.u32 %v4216_v54, %v3312_v55  ;;  %v3519_v63 = vor.u32 %v4267_v60, %v3516_v62  ;;  %v4258_v32 = vld [vmem:[#allocation8 + $0x28c] sm:$0xf]  ;;  %v4204_v39 = vld [vmem:[#allocation8 + $0xdc] sm:$0xf]  ;;  %v3360_v55 = vld [vmem:[#allocation8 + $0x1a4] sm:$0xf0] }
  0x69   :  { %659 = vmatmul.bf16.vlgmr.msrb.gmra.mxu2 %v4765_v35  ;;  %1371 = vmatpush.bf16.msra.mxu0 %v3239_v16  ;;  %v3262_v16 = vld [vmem:[#allocation8 + $0xd8] sm:$0xf]  ;;  %v4228_v54 = vld [vmem:[#allocation8 + $0x19c] sm:$0xf]  ;;  %v4225_v60 = vld [vmem:[#allocation8 + $0x184] sm:$0xf] }
  0x6a   :  { %1399 = vmatpush.bf16.msra.mxu2 %v3431_v5  ;;  %673 = vmatmul.bf16.vlgmr.msrb.gmra.mxu3 %v4765_v35  ;;  %v4208_v5 = vld [vmem:[#allocation8 + $0xf8] sm:$0xf0]  ;;  %s2873_s13 = sshll.u32 %s4677_s26, 4  ;;  %s2875_s16 = sshll.u32 %s4893_s10, 4  ;;  %s2874_s13 = int_to_ptr.vmem [resolvable:$true] %s2873_s13  ;;  %s2876_s16 = int_to_ptr.hbm [resolvable:$true] %s2875_s16 }
  0x6b   :  { %1413 = vmatpush.bf16.msra.mxu3 %v3527_v9  ;;  %1385 = vmatpush.bf16.msra.mxu1 %v3335_v17  ;;  %v4229_v9 = vld [vmem:[#allocation8 + $0x1a0] sm:$0xf0]  ;;  %v3275_v13 = vor.u32 %v4208_v5, %v3274_v4  ;;  %v3300_v4 = vld [vmem:[#allocation8 + $0x12c] sm:$0xf0]  ;;  %s4679_s17 = smov 8  }
  0x6c   :  { %645 = vmatmul.bf16.vlgmr.msrb.gmra.mxu1 %v4765_v35  ;;  %v4235_v35 = vld [vmem:[#allocation8 + $0x1d0] sm:$0xf0]  ;;  %v4205_v17 = vld [vmem:[#allocation8 + $0xe0] sm:$0xf0]  ;;  %v3359_v18 = vor.u32 %v4229_v9, %v3358_v8  ;;  %v3303_v5 = vor.u32 %v4213_v2, %v3300_v4  ;;  %v4264_v9 = vld [vmem:[#allocation8 + $0x2bc] sm:$0xf] }
  0x6d   :  { %1372 = vmatpush.bf16.msra.mxu0 %v3227_v28  ;;  %v3383_v58 = vor.u32 %v4235_v35, %v3382_v49  ;;  %v3263_v28 = vor.u32 %v4205_v17, %v3262_v16  ;;  %v4219_v49 = vld [vmem:[#allocation8 + $0x154] sm:$0xf]  ;;  %v3324_v35 = vld [vmem:[#allocation8 + $0x15c] sm:$0xf0]  ;;  %v3507_v11 = vor.u32 %v4264_v9, %v3504_v10  ;;  %v3288_v16 = vld [vmem:[#allocation8 + $0x114] sm:$0xf0] }
  0x6e   :  { %1400 = vmatpush.bf16.msra.mxu2 %v3419_v22  ;;  %v3442_v22 = vld [vmem:[#allocation8 + $0x240] sm:$0xf]  ;;  %v3327_v51 = vor.u32 %v4219_v49, %v3324_v35  ;;  %v3291_v17 = vor.u32 %v4210_v14, %v3288_v16  ;;  %v4177_v49 = vld [vmem:[#allocation8 + $0x4] sm:$0xf]  ;;  %v3156_v35 = vld [vmem:[#allocation8 + $0xc] sm:$0xf0] }
  0x6f   :  { %1414 = vmatpush.bf16.msra.mxu3 %v3515_v23  ;;  %1386 = vmatpush.bf16.msra.mxu1 %v3323_v29  ;;  %v3154_v23 = vld [vmem:[#allocation8] sm:$0xf]  ;;  %v4178_v29 = vld [vmem:[#allocation8 + $0x8] sm:$0xf0]  ;;  %v3443_v40 = vor.u32 %v4250_v24, %v3442_v22  ;;  %v3492_v22 = vld [vmem:[#allocation8 + $0x2ac] sm:$0xf0] }
  0x70   :  { %v3155_v43 = vor.u32 %v4178_v29, %v3154_v23  ;;  %v4183_v24 = vld [vmem:[#allocation8 + $0x34] sm:$0xf]  ;;  %v4775_v2 = vld [vmem:[#allocation7] sm:$0xff] }
  0x71   :  { %1373 = vmatpush.bf16.msra.mxu0 %v3215_v41  ;;  %v3435_v41 = vor.u32 %v4246_v25, %v3432_v26  ;;  %v3180_v25 = vld [vmem:[#allocation8 + $0x3c] sm:$0xf0]  ;;  %v4207_v26 = vld [vmem:[#allocation8 + $0xf4] sm:$0xf]  ;;  %v226_v4 = vperm.slane %v4775_v2, 1 }
  0x72   :  { %1401 = vmatpush.bf16.msra.mxu2 %v3407_v34  ;;  %v4198_v34 = vld [vmem:[#allocation8 + $0xac] sm:$0xf] }
  0x73   :  { %1415 = vmatpush.bf16.msra.mxu3 %v3503_v36  ;;  %1387 = vmatpush.bf16.msra.mxu1 %v3311_v42  ;;  %v3347_v36 = vor.u32 %v4226_v21, %v3346_v20  ;;  %v3531_v42 = vor.u32 %v4270_v30, %v3528_v31  ;;  %v3243_v45 = vor.u32 %v4198_v34, %v3240_v37  ;;  %v4261_v21 = vld [vmem:[#allocation8 + $0x2a4] sm:$0xf]  ;;  %v4234_v30 = vld [vmem:[#allocation8 + $0x1cc] sm:$0xf]  ;;  %v3384_v31 = vld [vmem:[#allocation8 + $0x1d4] sm:$0xf0] }
  0x74   :  { %v3495_v23 = vor.u32 %v4261_v21, %v3492_v22  ;;  %v3387_v33 = vor.u32 %v4234_v30, %v3384_v31  ;;  %v3480_v34 = vld [vmem:[#allocation8 + $0x294] sm:$0xf0]  ;;  %v4180_v37 = vld [vmem:[#allocation8 + $0x1c] sm:$0xf] }
  0x75   :  { %1374 = vmatpush.bf16.msra.mxu0 %v3203_v52  ;;  %v4192_v52 = vld [vmem:[#allocation8 + $0x7c] sm:$0xf] }
  0x76   :  { %1402 = vmatpush.bf16.msra.mxu2 %v3395_v47  ;;  %v4195_v47 = vld [vmem:[#allocation8 + $0x94] sm:$0xf]  ;;  %v4224_v30 = vld [vmem:[#allocation8 + $0x178] sm:$0xf0] }
  0x77   :  { %1416 = vmatpush.bf16.msra.mxu3 %v3491_v48  ;;  %1388 = vmatpush.bf16.msra.mxu1 %v3299_v53  ;;  %v3228_v48 = vld [vmem:[#allocation8 + $0x9c] sm:$0xf0]  ;;  %v3216_v53 = vld [vmem:[#allocation8 + $0x84] sm:$0xf0] }
  0x78   :  { %v3231_v50 = vor.u32 %v4195_v47, %v3228_v48  ;;  %v3219_v56 = vor.u32 %v4192_v52, %v3216_v53  ;;  %v3468_v47 = vld [vmem:[#allocation8 + $0x27c] sm:$0xf0]  ;;  %v3252_v52 = vld [vmem:[#allocation8 + $0xcc] sm:$0xf0] }
  0x79   :  { %1375 = vmatpush.bf16.msra.mxu0 %v3191_v0  ;;  %v4189_v0 = vld [vmem:[#allocation8 + $0x64] sm:$0xf] }
  0x7a   :  { %1403 = vmatpush.bf16.msra.mxu2 %v3383_v58  ;;  %v4243_v58 = vld [vmem:[#allocation8 + $0x214] sm:$0xf] }
  0x7b   :  { %1417 = vmatpush.bf16.msra.mxu3 %v3479_v59  ;;  %1389 = vmatpush.bf16.msra.mxu1 %v3287_v1  ;;  %v3420_v59 = vld [vmem:[#allocation8 + $0x21c] sm:$0xf0]  ;;  %v3204_v1 = vld [vmem:[#allocation8 + $0x6c] sm:$0xf0] }
  0x7c   :  { %v3423_v61 = vor.u32 %v4243_v58, %v3420_v59  ;;  %v3207_v3 = vor.u32 %v4189_v0, %v3204_v1  ;;  %v3363_v58 = vor.u32 %v4228_v54, %v3360_v55  ;;  %v3444_v0 = vld [vmem:[#allocation8 + $0x24c] sm:$0xf0] }
  0x7d   :  { %1376 = vmatpush.bf16.msra.mxu0 %v3179_v12  ;;  %v4186_v12 = vld [vmem:[#allocation8 + $0x4c] sm:$0xf] }
  0x7e   :  { %1404 = vmatpush.bf16.msra.mxu2 %v3371_v6  ;;  %v4240_v6 = vld [vmem:[#allocation8 + $0x1fc] sm:$0xf] }
  0x7f   :  { %1418 = vmatpush.bf16.msra.mxu3 %v3467_v7  ;;  %1390 = vmatpush.bf16.msra.mxu1 %v3275_v13  ;;  %v3408_v7 = vld [vmem:[#allocation8 + $0x204] sm:$0xf0]  ;;  %v3192_v13 = vld [vmem:[#allocation8 + $0x54] sm:$0xf0] }
  0x80   :  { %v3411_v8 = vor.u32 %v4240_v6, %v3408_v7  ;;  %v3195_v15 = vor.u32 %v4186_v12, %v3192_v13  ;;  %v228_v13 = vperm.slane %v4775_v2, 3 }
  0x81   :  { %1377 = vmatpush.bf16.msra.mxu0 %v3167_v27  ;;  %v3183_v27 = vor.u32 %v4183_v24, %v3180_v25  ;;  %v3246_v24 = vld [vmem:[#allocation8 + $0xb0] sm:$0xf] }
  0x82   :  { %1405 = vmatpush.bf16.msra.mxu2 %v3359_v18  ;;  %v4237_v18 = vld [vmem:[#allocation8 + $0x1e4] sm:$0xf] }
  0x83   :  { %1419 = vmatpush.bf16.msra.mxu3 %v3455_v19  ;;  %1391 = vmatpush.bf16.msra.mxu1 %v3263_v28  ;;  %v3396_v19 = vld [vmem:[#allocation8 + $0x1ec] sm:$0xf0]  ;;  %v3276_v28 = vld [vmem:[#allocation8 + $0xfc] sm:$0xf0] }
  0x84   :  { %v3399_v20 = vor.u32 %v4237_v18, %v3396_v19  ;;  %v3279_v29 = vor.u32 %v4207_v26, %v3276_v28  ;;  %v4200_v28 = vld [vmem:[#allocation8 + $0xb8] sm:$0xf0] }
  0x85   :  { %1378 = vmatpush.bf16.msra.mxu0 %v3155_v43  ;;  %v4231_v43 = vld [vmem:[#allocation8 + $0x1b4] sm:$0xf] }
  0x86   :  { %1406 = vmatpush.bf16.msra.mxu2 %v3347_v36  ;;  %v3483_v36 = vor.u32 %v4258_v32, %v3480_v34 }
  0x87   :  { %1420 = vmatpush.bf16.msra.mxu3 %v3443_v40  ;;  %1392 = vmatpush.bf16.msra.mxu1 %v3251_v44  ;;  %v3171_v40 = vor.u32 %v4180_v37, %v3168_v38  ;;  %v3372_v44 = vld [vmem:[#allocation8 + $0x1bc] sm:$0xf0] }
  0x89   :  { %1427 = vmatpush.bf16.msrb.mxu0 %v3243_v45  ;;  %v4255_v45 = vld [vmem:[#allocation8 + $0x274] sm:$0xf] }
  0x8a   :  { %1455 = vmatpush.bf16.msrb.mxu2 %v3435_v41  ;;  %v3264_v41 = vld [vmem:[#allocation8 + $0xe4] sm:$0xf0]  ;;  %v3471_v48 = vor.u32 %v4255_v45, %v3468_v47  ;;  %v3330_v47 = vld [vmem:[#allocation8 + $0x158] sm:$0xf] }
  0x8b   :  { %1469 = vmatpush.bf16.msrb.mxu3 %v3531_v42  ;;  %1441 = vmatpush.bf16.msrb.mxu1 %v3339_v46  ;;  %v3267_v42 = vor.u32 %v4204_v39, %v3264_v41  ;;  %v3375_v46 = vor.u32 %v4231_v43, %v3372_v44  ;;  %v4197_v43 = vld [vmem:[#allocation8 + $0xa0] sm:$0xf0] }
  0x8d   :  { %1428 = vmatpush.bf16.msrb.mxu0 %v3231_v50  ;;  %v4201_v50 = vld [vmem:[#allocation8 + $0xc4] sm:$0xf] }
  0x8e   :  { %1456 = vmatpush.bf16.msrb.mxu2 %v3423_v61  ;;  %v3255_v53 = vor.u32 %v4201_v50, %v3252_v52  ;;  %v3348_v61 = vld [vmem:[#allocation8 + $0x18c] sm:$0xf0] }
  0x8f   :  { %1442 = vmatpush.bf16.msrb.mxu1 %v3327_v51  ;;  %1470 = vmatpush.bf16.msrb.mxu3 %v3519_v63  ;;  %v3159_v51 = vor.u32 %v4177_v49, %v3156_v35  ;;  %v3351_v62 = vor.u32 %v4225_v60, %v3348_v61  ;;  %v4249_v63 = vld [vmem:[#allocation8 + $0x244] sm:$0xf]  ;;  %v3438_v50 = vld [vmem:[#allocation8 + $0x230] sm:$0xf]  ;;  %v4218_v60 = vld [vmem:[#allocation8 + $0x148] sm:$0xf0] }
  0x90   :  { %v3447_v1 = vor.u32 %v4249_v63, %v3444_v0  ;;  %v3534_v52 = vld [vmem:[#allocation8 + $0x2f0] sm:$0xf] }
  0x91   :  { %1429 = vmatpush.bf16.msrb.mxu0 %v3219_v56  ;;  %v4252_v56 = vld [vmem:[#allocation8 + $0x25c] sm:$0xf] }
  0x92   :  { %1457 = vmatpush.bf16.msrb.mxu2 %v3411_v8 }
  0x93   :  { %1443 = vmatpush.bf16.msrb.mxu1 %v3315_v57  ;;  %1471 = vmatpush.bf16.msrb.mxu3 %v3507_v11  ;;  %v3456_v57 = vld [vmem:[#allocation8 + $0x264] sm:$0xf0]  ;;  %v227_v11 = vperm.slane %v4775_v2, 2 }
  0x94   :  { %v3459_v59 = vor.u32 %v4252_v56, %v3456_v57  ;;  %v4272_v56 = vld [vmem:[#allocation8 + $0x2f8] sm:$0xf0]  ;;  %v3222_v57 = vld [vmem:[#allocation8 + $0x80] sm:$0xf] }
  0x95   :  { %1430 = vmatpush.bf16.msrb.mxu0 %v3207_v3  ;;  %v225_v3 = vperm.slane %v4775_v2, 0 }
  0x96   :  { %1458 = vmatpush.bf16.msrb.mxu2 %v3399_v20 }
  0x97   :  { %1444 = vmatpush.bf16.msrb.mxu1 %v3303_v5  ;;  %1472 = vmatpush.bf16.msrb.mxu3 %v3495_v23 }
  0x99   :  { %1431 = vmatpush.bf16.msrb.mxu0 %v3195_v15 }
  0x9a   :  { %1459 = vmatpush.bf16.msrb.mxu2 %v3387_v33 }
  0x9b   :  { %1445 = vmatpush.bf16.msrb.mxu1 %v3291_v17  ;;  %1473 = vmatpush.bf16.msrb.mxu3 %v3483_v36 }
  0x9d   :  { %1432 = vmatpush.bf16.msrb.mxu0 %v3183_v27 }
  0x9e   :  { %1460 = vmatpush.bf16.msrb.mxu2 %v3375_v46 }
  0x9f   :  { %1446 = vmatpush.bf16.msrb.mxu1 %v3279_v29  ;;  %1474 = vmatpush.bf16.msrb.mxu3 %v3471_v48  ;;  %v3342_v29 = vld [vmem:[#allocation8 + $0x170] sm:$0xf]  ;;  %v4221_v48 = vld [vmem:[#allocation8 + $0x160] sm:$0xf0] }
  0xa0   :  { %v3343_v41 = vor.u32 %v4224_v30, %v3342_v29  ;;  %v3331_v55 = vor.u32 %v4221_v48, %v3330_v47  ;;  %v3402_v30 = vld [vmem:[#allocation8 + $0x1e8] sm:$0xf]  ;;  %v3486_v47 = vld [vmem:[#allocation8 + $0x290] sm:$0xf]  ;;  %v4260_v48 = vld [vmem:[#allocation8 + $0x298] sm:$0xf0] }
  0xa1   :  { %1433 = vmatpush.bf16.msrb.mxu0 %v3171_v40  ;;  %v3247_v40 = vor.u32 %v4200_v28, %v3246_v24  ;;  %v3198_v24 = vld [vmem:[#allocation8 + $0x50] sm:$0xf] }
  0xa2   :  { %1461 = vmatpush.bf16.msrb.mxu2 %v3363_v58  ;;  %v4194_v58 = vld [vmem:[#allocation8 + $0x88] sm:$0xf0] }
  0xa3   :  { %1447 = vmatpush.bf16.msrb.mxu1 %v3267_v42  ;;  %1475 = vmatpush.bf16.msrb.mxu3 %v3459_v59  ;;  %v3234_v42 = vld [vmem:[#allocation8 + $0x98] sm:$0xf]  ;;  %v3318_v59 = vld [vmem:[#allocation8 + $0x140] sm:$0xf] }
  0xa4   :  { %v3235_v54 = vor.u32 %v4197_v43, %v3234_v42  ;;  %v3390_v43 = vld [vmem:[#allocation8 + $0x1d0] sm:$0xf] }
  0xa5   :  { %1434 = vmatpush.bf16.msrb.mxu0 %v3159_v51  ;;  %v4248_v51 = vld [vmem:[#allocation8 + $0x238] sm:$0xf0] }
  0xa6   :  { %1462 = vmatpush.bf16.msrb.mxu2 %v3351_v62 }
  0xa7   :  { %1448 = vmatpush.bf16.msrb.mxu1 %v3255_v53  ;;  %1476 = vmatpush.bf16.msrb.mxu3 %v3447_v1  ;;  %v3439_v1 = vor.u32 %v4248_v51, %v3438_v50  ;;  %v3174_v50 = vld [vmem:[#allocation8 + $0x20] sm:$0xf]  ;;  %v4182_v51 = vld [vmem:[#allocation8 + $0x28] sm:$0xf0] }
  0xc5   :  { %v576_v5 = vpop.f32.mrf.mxu0  ;;  %v590_v6 = vpop.f32.mrf.mxu1 }
  0xc6   :  { %v577_v7 = vadd.f32 %v576_v5, %v225_v3  ;;  %v591_v8 = vadd.f32 %v590_v6, %v226_v4  ;;  %v3426_v5 = vld [vmem:[#allocation8 + $0x218] sm:$0xf]  ;;  %v4245_v6 = vld [vmem:[#allocation8 + $0x220] sm:$0xf0] }
  0xc8   :  { %v679_v9 = vmax.f32 %v577_v7, 0.0  ;;  %v680_v10 = vmax.f32 %v591_v8, 0.0 }
  0xca   :  { %v695_v18 = vpack.c.bf16 %v680_v10, %v679_v9  ;;  %v3319_v9 = vor.u32 %v4218_v60, %v3318_v59  ;;  %v3522_v10 = vld [vmem:[#allocation8 + $0x2d8] sm:$0xf]  ;;  %v4257_v59 = vld [vmem:[#allocation8 + $0x280] sm:$0xf0]  ;;  %v3175_v60 = vor.u32 %v4182_v51, %v3174_v50  ;;  %v4364_v50 = vld [vmem:[#allocation10 + $0x2d8] sm:$0xf0] }
  0xcc   :  { %v604_v12 = vpop.f32.mrf.mxu2  ;;  %v843_v25 = vunpack.c.l.b16 %v695_v18  ;;  %v844_v26 = vunpack.c.h.b16 %v695_v18  ;;  %v3414_v18 = vld [vmem:[#allocation8 + $0x200] sm:$0xf] }
  0xcd   :  { %v618_v14 = vpop.f32.mrf.mxu3  ;;  %v578_v15 = vpop.f32.mrf.mxu0  ;;  %v605_v20 = vadd.f32 %v604_v12, %v227_v11  ;;  %v3210_v12 = vld [vmem:[#allocation8 + $0x68] sm:$0xf] }
  0xce   :  { %v579_v16 = vadd.f32 %v578_v15, %v225_v3  ;;  %v592_v17 = vpop.f32.mrf.mxu1  ;;  %v619_v21 = vadd.f32 %v618_v14, %v228_v13  ;;  %v3535_v3 = vor.u32 %v4272_v56, %v3534_v52  ;;  %v3306_v14 = vld [vmem:[#allocation8 + $0x128] sm:$0xf]  ;;  %v4215_v15 = vld [vmem:[#allocation8 + $0x130] sm:$0xf0]  ;;  %v3270_v52 = vld [vmem:[#allocation8 + $0xe0] sm:$0xf] }
  0xcf   :  { %v593_v19 = vadd.f32 %v592_v17, %v226_v4  ;;  %v681_v31 = vmax.f32 %v605_v20, 0.0  ;;  %v3223_v4 = vor.u32 %v4194_v58, %v3222_v57  ;;  %v3307_v20 = vor.u32 %v4215_v15, %v3306_v14  ;;  %v3378_v56 = vld [vmem:[#allocation8 + $0x1b8] sm:$0xf]  ;;  %v4233_v57 = vld [vmem:[#allocation8 + $0x1c0] sm:$0xf0] }
  0xd0   :  { %v687_v22 = vmax.f32 %v579_v16, 0.0  ;;  %v682_v32 = vmax.f32 %v619_v21, 0.0  ;;  %v3427_v16 = vor.u32 %v4245_v6, %v3426_v5  ;;  %v4242_v21 = vld [vmem:[#allocation8 + $0x208] sm:$0xf0]  ;;  %v3474_v58 = vld [vmem:[#allocation8 + $0x278] sm:$0xf]  ;;  %v3379_v5 = vor.u32 %v4233_v57, %v3378_v56 }
  0xd1   :  { %v688_v23 = vmax.f32 %v593_v19, 0.0  ;;  %v3415_v28 = vor.u32 %v4242_v21, %v3414_v18  ;;  %v3475_v6 = vor.u32 %v4257_v59, %v3474_v58  ;;  %v4254_v14 = vld [vmem:[#allocation8 + $0x268] sm:$0xf0]  ;;  %v3706_v21 = vld [vmem:[#allocation10 + $0x150] sm:$0xf] }
  0xd2   :  { %v696_v49 = vpack.c.bf16 %v682_v32, %v681_v31  ;;  %v4239_v31 = vld [vmem:[#allocation8 + $0x1f0] sm:$0xf0]  ;;  %v3498_v32 = vld [vmem:[#allocation8 + $0x2a8] sm:$0xf]  ;;  %v4286_v56 = vld [vmem:[#allocation10 + $0x68] sm:$0xf0] }
  0xd3   :  { %v699_v27 = vpack.c.bf16 %v688_v23, %v687_v22  ;;  %v3510_v22 = vld [vmem:[#allocation8 + $0x2c0] sm:$0xf]  ;;  %v4266_v23 = vld [vmem:[#allocation8 + $0x2c8] sm:$0xf0]  ;;  %v3790_v59 = vld [vmem:[#allocation10 + $0x1f8] sm:$0xf] }
  0xd4   :  { %v606_v33 = vpop.f32.mrf.mxu2  ;;  %v845_v61 = vunpack.c.l.b16 %v696_v49  ;;  %v846_v62 = vunpack.c.h.b16 %v696_v49  ;;  %v3511_v29 = vor.u32 %v4266_v23, %v3510_v22  ;;  %v3682_v57 = vld [vmem:[#allocation10 + $0x120] sm:$0xf] }
  0xd5   :  { %v847_v34 = vunpack.c.l.b16 %v699_v27  ;;  %v848_v36 = vunpack.c.h.b16 %v699_v27  ;;  %v607_v37 = vadd.f32 %v606_v33, %v227_v11  ;;  %v620_v38 = vpop.f32.mrf.mxu3  ;;  %v4269_v11 = vld [vmem:[#allocation8 + $0x2e0] sm:$0xf0]  ;;  %v4212_v27 = vld [vmem:[#allocation8 + $0x118] sm:$0xf0]  ;;  %v4263_v33 = vld [vmem:[#allocation8 + $0x2b0] sm:$0xf0] }
  0xd6   :  { %v621_v39 = vadd.f32 %v620_v38, %v228_v13  ;;  %v4191_v13 = vld [vmem:[#allocation8 + $0x70] sm:$0xf0]  ;;  %v3523_v17 = vor.u32 %v4269_v11, %v3522_v10  ;;  %v4185_v38 = vld [vmem:[#allocation8 + $0x40] sm:$0xf0]  ;;  %v3499_v42 = vor.u32 %v4263_v33, %v3498_v32  ;;  %v3366_v11 = vld [vmem:[#allocation8 + $0x1a0] sm:$0xf] }
  0xd7   :  { %v4781_v44 = vpack.c.b16 %v847_v34, %v843_v25  ;;  %v4783_v45 = vpack.c.b16 %v848_v36, %v844_v26  ;;  %v689_v46 = vmax.f32 %v607_v37, 0.0  ;;  %v3211_v19 = vor.u32 %v4191_v13, %v3210_v12  ;;  %v4188_v25 = vld [vmem:[#allocation8 + $0x58] sm:$0xf0]  ;;  %v3294_v26 = vld [vmem:[#allocation8 + $0x110] sm:$0xf] }
  0xd8   :  { %v690_v35 = vmax.f32 %v621_v39, 0.0  ;;  %v3199_v34 = vor.u32 %v4188_v25, %v3198_v24  ;;  %v3295_v36 = vor.u32 %v4212_v27, %v3294_v26  ;;  %v3186_v37 = vld [vmem:[#allocation8 + $0x38] sm:$0xf]  ;;  %v4319_v10 = vld [vmem:[#allocation10 + $0x170] sm:$0xf0] }
  0xd9   :  { %1379 = vmatmul.bf16.vlgmr.msra.gmra.mxu0 %v4781_v44  ;;  %1393 = vmatmul.bf16.vlgmr.msra.gmra.mxu1 %v4783_v45  ;;  %v3282_v39 = vld [vmem:[#allocation8 + $0xf8] sm:$0xf]  ;;  %v3187_v49 = vor.u32 %v4185_v38, %v3186_v37  ;;  %v4230_v12 = vld [vmem:[#allocation8 + $0x1a8] sm:$0xf0]  ;;  %v3462_v13 = vld [vmem:[#allocation8 + $0x260] sm:$0xf] }
  0xda   :  { %v700_v53 = vpack.c.bf16 %v690_v35, %v689_v46  ;;  %1483 = vmatpush.bf16.msra.mxu0 %v3247_v40  ;;  %1497 = vmatpush.bf16.msra.mxu1 %v3343_v41  ;;  %v4209_v40 = vld [vmem:[#allocation8 + $0x100] sm:$0xf0]  ;;  %v3403_v41 = vor.u32 %v4239_v31, %v3402_v30  ;;  %v4236_v46 = vld [vmem:[#allocation8 + $0x1d8] sm:$0xf0]  ;;  %v3367_v22 = vor.u32 %v4230_v12, %v3366_v11  ;;  %v3354_v25 = vld [vmem:[#allocation8 + $0x188] sm:$0xf] }
  0xdb   :  { %v3283_v35 = vor.u32 %v4209_v40, %v3282_v39  ;;  %v3463_v23 = vor.u32 %v4254_v14, %v3462_v13  ;;  %v4316_v24 = vld [vmem:[#allocation10 + $0x158] sm:$0xf0]  ;;  %v4227_v26 = vld [vmem:[#allocation8 + $0x190] sm:$0xf0]  ;;  %v3450_v27 = vld [vmem:[#allocation8 + $0x248] sm:$0xf] }
  0xdc   :  { %v849_v63 = vunpack.c.l.b16 %v700_v53  ;;  %v850_v0 = vunpack.c.h.b16 %v700_v53  ;;  %v4206_v53 = vld [vmem:[#allocation8 + $0xe8] sm:$0xf0]  ;;  %v4343_v32 = vld [vmem:[#allocation10 + $0x230] sm:$0xf0]  ;;  %v3910_v33 = vld [vmem:[#allocation10 + $0x2e8] sm:$0xf]  ;;  %v3707_v37 = vor.u32 %v4316_v24, %v3706_v21  ;;  %v3355_v39 = vor.u32 %v4227_v26, %v3354_v25 }
  0xdd   :  { %v3598_v38 = vld [vmem:[#allocation10 + $0x78] sm:$0xf]  ;;  %v4307_v11 = vld [vmem:[#allocation10 + $0x110] sm:$0xf0]  ;;  %v231_v14 = vperm.slane %v4775_v2, 6 }
  0xde   :  { %v4787_v7 = vpack.c.b16 %v849_v63, %v845_v61  ;;  %v4789_v8 = vpack.c.b16 %v850_v0, %v846_v62  ;;  %1484 = vmatpush.bf16.msra.mxu0 %v3235_v54  ;;  %1498 = vmatpush.bf16.msra.mxu1 %v3331_v55  ;;  %v3391_v54 = vor.u32 %v4236_v46, %v3390_v43  ;;  %v3162_v62 = vld [vmem:[#allocation8 + $0x8] sm:$0xf]  ;;  %v4179_v63 = vld [vmem:[#allocation8 + $0x10] sm:$0xf0]  ;;  %v4313_v43 = vld [vmem:[#allocation10 + $0x140] sm:$0xf0] }
  0xdf   :  { %v3487_v55 = vor.u32 %v4260_v48, %v3486_v47  ;;  %v3271_v61 = vor.u32 %v4206_v53, %v3270_v52  ;;  %v3258_v0 = vld [vmem:[#allocation8 + $0xc8] sm:$0xf]  ;;  %v3163_v15 = vor.u32 %v4179_v63, %v3162_v62  ;;  %v3802_v48 = vld [vmem:[#allocation10 + $0x210] sm:$0xf]  ;;  %v3586_v53 = vld [vmem:[#allocation10 + $0x60] sm:$0xf] }
  0xe0   :  { %1407 = vmatmul.bf16.vlgmr.msra.gmra.mxu2 %v4787_v7  ;;  %1421 = vmatmul.bf16.vlgmr.msra.gmra.mxu3 %v4789_v8  ;;  %v4361_v62 = vld [vmem:[#allocation10 + $0x2c0] sm:$0xf0]  ;;  %v229_v63 = vperm.slane %v4775_v2, 4  ;;  %v3562_v24 = vld [vmem:[#allocation10 + $0x30] sm:$0xf] }
  0xe1   :  { %1511 = vmatpush.bf16.msra.mxu2 %v3439_v1  ;;  %1525 = vmatpush.bf16.msra.mxu3 %v3535_v3  ;;  %v4203_v1 = vld [vmem:[#allocation8 + $0xd0] sm:$0xf0]  ;;  %v3622_v3 = vld [vmem:[#allocation10 + $0xa8] sm:$0xf]  ;;  %v4280_v26 = vld [vmem:[#allocation10 + $0x38] sm:$0xf0] }
  0xe2   :  { %1485 = vmatpush.bf16.msra.mxu0 %v3223_v4  ;;  %1499 = vmatpush.bf16.msra.mxu1 %v3319_v9  ;;  %v4295_v4 = vld [vmem:[#allocation10 + $0xb0] sm:$0xf0]  ;;  %v3718_v9 = vld [vmem:[#allocation10 + $0x168] sm:$0xf] }
  0xe3   :  { %v3719_v18 = vor.u32 %v4319_v10, %v3718_v9  ;;  %v4283_v9 = vld [vmem:[#allocation10 + $0x50] sm:$0xf0]  ;;  %v3670_v10 = vld [vmem:[#allocation10 + $0x108] sm:$0xf] }
  0xe5   :  { %1512 = vmatpush.bf16.msra.mxu2 %v3427_v16  ;;  %1526 = vmatpush.bf16.msra.mxu3 %v3523_v17  ;;  %v3259_v16 = vor.u32 %v4203_v1, %v3258_v0  ;;  %v3623_v17 = vor.u32 %v4295_v4, %v3622_v3  ;;  %v4797_v30 = vpop.f32.mrf.mxu0  ;;  %v230_v0 = vperm.slane %v4775_v2, 5  ;;  %v3587_v1 = vor.u32 %v4286_v56, %v3586_v53  ;;  %v3574_v4 = vld [vmem:[#allocation10 + $0x48] sm:$0xf]  ;;  %v4328_v56 = vld [vmem:[#allocation10 + $0x1b8] sm:$0xf0] }
  0xe6   :  { %1486 = vmatpush.bf16.msra.mxu0 %v3211_v19  ;;  %1500 = vmatpush.bf16.msra.mxu1 %v3307_v20  ;;  %v3610_v19 = vld [vmem:[#allocation10 + $0x90] sm:$0xf]  ;;  %v4292_v20 = vld [vmem:[#allocation10 + $0x98] sm:$0xf0] }
  0xe9   :  { %1513 = vmatpush.bf16.msra.mxu2 %v3415_v28  ;;  %1527 = vmatpush.bf16.msra.mxu3 %v3511_v29  ;;  %v4251_v28 = vld [vmem:[#allocation8 + $0x250] sm:$0xf0]  ;;  %v3814_v29 = vld [vmem:[#allocation10 + $0x228] sm:$0xf]  ;;  %v4799_v31 = vpop.f32.mrf.mxu1 }
  0xea   :  { %1435 = vmatmul.bf16.vlgmr.msrb.gmra.mxu0 %v4781_v44  ;;  %1449 = vmatmul.bf16.vlgmr.msrb.gmra.mxu1 %v4783_v45  ;;  %v3451_v40 = vor.u32 %v4251_v28, %v3450_v27  ;;  %v3815_v46 = vor.u32 %v4343_v32, %v3814_v29  ;;  %v3658_v27 = vld [vmem:[#allocation10 + $0xf0] sm:$0xf]  ;;  %v4304_v28 = vld [vmem:[#allocation10 + $0xf8] sm:$0xf0]  ;;  %v3766_v32 = vld [vmem:[#allocation10 + $0x1c8] sm:$0xf] }
  0xeb   :  { %1487 = vmatpush.bf16.msra.mxu0 %v3199_v34  ;;  %1501 = vmatpush.bf16.msra.mxu1 %v3295_v36  ;;  %v4367_v34 = vld [vmem:[#allocation10 + $0x2f0] sm:$0xf0]  ;;  %v3611_v36 = vor.u32 %v4292_v20, %v3610_v19  ;;  %v4358_v19 = vld [vmem:[#allocation10 + $0x2a8] sm:$0xf0]  ;;  %v633_v20 = vadd.f32 %v4797_v30, %v229_v63 }
  0xec   :  { %v3911_v47 = vor.u32 %v4367_v34, %v3910_v33  ;;  %v3862_v33 = vld [vmem:[#allocation10 + $0x288] sm:$0xf] }
  0xed   :  { %1514 = vmatpush.bf16.msra.mxu2 %v3403_v41  ;;  %1528 = vmatpush.bf16.msra.mxu3 %v3499_v42  ;;  %v4289_v41 = vld [vmem:[#allocation10 + $0x80] sm:$0xf0]  ;;  %v3694_v42 = vld [vmem:[#allocation10 + $0x138] sm:$0xf] }
  0xee   :  { %v3599_v51 = vor.u32 %v4289_v41, %v3598_v38  ;;  %v3695_v52 = vor.u32 %v4313_v43, %v3694_v42  ;;  %v3563_v42 = vor.u32 %v4280_v26, %v3562_v24  ;;  %v3659_v43 = vor.u32 %v4304_v28, %v3658_v27  ;;  %v4291_v24 = vld [vmem:[#allocation10 + $0x94] sm:$0xf] }
  0xef   :  { %1488 = vmatpush.bf16.msra.mxu0 %v3187_v49  ;;  %1502 = vmatpush.bf16.msra.mxu1 %v3283_v35  ;;  %v4340_v49 = vld [vmem:[#allocation10 + $0x218] sm:$0xf0]  ;;  %v3898_v35 = vld [vmem:[#allocation10 + $0x2d0] sm:$0xf]  ;;  %v4315_v26 = vld [vmem:[#allocation10 + $0x154] sm:$0xf] }
  0xf0   :  { %1463 = vmatmul.bf16.vlgmr.msrb.gmra.mxu2 %v4787_v7  ;;  %1477 = vmatmul.bf16.vlgmr.msrb.gmra.mxu3 %v4789_v8  ;;  %v3899_v58 = vor.u32 %v4364_v50, %v3898_v35 }
  0xf1   :  { %1515 = vmatpush.bf16.msra.mxu2 %v3391_v54  ;;  %1529 = vmatpush.bf16.msra.mxu3 %v3487_v55  ;;  %v660_v54 = vpop.f32.mrf.mxu2  ;;  %v674_v55 = vpop.f32.mrf.mxu3 }
  0xf3   :  { %1489 = vmatpush.bf16.msra.mxu0 %v3175_v60  ;;  %1503 = vmatpush.bf16.msra.mxu1 %v3271_v61  ;;  %v4337_v60 = vld [vmem:[#allocation10 + $0x200] sm:$0xf0]  ;;  %v3886_v61 = vld [vmem:[#allocation10 + $0x2b8] sm:$0xf] }
  0xf4   :  { %v3791_v12 = vor.u32 %v4337_v60, %v3790_v59  ;;  %v3887_v13 = vor.u32 %v4361_v62, %v3886_v61  ;;  %v3538_v59 = vld [vmem:[#allocation10] sm:$0xf]  ;;  %v4274_v62 = vld [vmem:[#allocation10 + $0x8] sm:$0xf0] }
  0xf5   :  { %1516 = vmatpush.bf16.msra.mxu2 %v3379_v5  ;;  %1530 = vmatpush.bf16.msra.mxu3 %v3475_v6  ;;  %v634_v5 = vpop.f32.mrf.mxu0  ;;  %v648_v6 = vpop.f32.mrf.mxu1 }
  0xf6   :  { %v649_v21 = vadd.f32 %v648_v6, %v230_v0 }
  0xf7   :  { %1490 = vmatpush.bf16.msra.mxu0 %v3163_v15  ;;  %1504 = vmatpush.bf16.msra.mxu1 %v3259_v16  ;;  %v232_v15 = vperm.slane %v4775_v2, 7  ;;  %v3778_v16 = vld [vmem:[#allocation10 + $0x1e0] sm:$0xf]  ;;  %v4811_v2 = vadd.f32 %v660_v54, %v231_v14 }
  0xf8   :  { %v692_v41 = vmax.f32 %v649_v21, 0.0 }
  0xf9   :  { %1517 = vmatpush.bf16.msra.mxu2 %v3367_v22  ;;  %1531 = vmatpush.bf16.msra.mxu3 %v3463_v23  ;;  %v3575_v22 = vor.u32 %v4283_v9, %v3574_v4  ;;  %v3671_v23 = vor.u32 %v4307_v11, %v3670_v10  ;;  %v4813_v29 = vadd.f32 %v674_v55, %v232_v15  ;;  %v662_v34 = vpop.f32.mrf.mxu2  ;;  %v3754_v55 = vld [vmem:[#allocation10 + $0x1b0] sm:$0xf]  ;;  %v4294_v4 = vld [vmem:[#allocation10 + $0xac] sm:$0xf]  ;;  %v3720_v11 = vld [vmem:[#allocation10 + $0x174] sm:$0xf0] }
  0xfa   :  { %1491 = vmatmul.bf16.vlgmr.msra.gmra.mxu0 %v4781_v44  ;;  %1505 = vmatmul.bf16.vlgmr.msra.gmra.mxu1 %v4783_v45  ;;  %v4310_v44 = vld [vmem:[#allocation10 + $0x128] sm:$0xf0]  ;;  %v3803_v45 = vor.u32 %v4340_v49, %v3802_v48  ;;  %v3646_v48 = vld [vmem:[#allocation10 + $0xd8] sm:$0xf]  ;;  %v4301_v49 = vld [vmem:[#allocation10 + $0xe0] sm:$0xf0]  ;;  %v663_v35 = vadd.f32 %v662_v34, %v231_v14  ;;  %v3755_v6 = vor.u32 %v4328_v56, %v3754_v55 }
  0xfb   :  { %2207 = vmatpush.bf16.msrb.mxu0 %v3623_v17  ;;  %2221 = vmatpush.bf16.msrb.mxu1 %v3719_v18  ;;  %v3683_v3 = vor.u32 %v4310_v44, %v3682_v57  ;;  %v4334_v17 = vld [vmem:[#allocation10 + $0x1e8] sm:$0xf0]  ;;  %v3874_v18 = vld [vmem:[#allocation10 + $0x2a0] sm:$0xf]  ;;  %v3850_v44 = vld [vmem:[#allocation10 + $0x270] sm:$0xf]  ;;  %v3647_v61 = vor.u32 %v4301_v49, %v3646_v48 }
  0xfc   :  { %v3779_v25 = vor.u32 %v4334_v17, %v3778_v16  ;;  %v3875_v30 = vor.u32 %v4358_v19, %v3874_v18  ;;  %v4318_v10 = vld [vmem:[#allocation10 + $0x16c] sm:$0xf]  ;;  %v4325_v17 = vld [vmem:[#allocation10 + $0x1a0] sm:$0xf0]  ;;  %v3838_v18 = vld [vmem:[#allocation10 + $0x258] sm:$0xf] }
  0xfd   :  { %1518 = vmatpush.bf16.msra.mxu2 %v3355_v39  ;;  %1532 = vmatpush.bf16.msra.mxu3 %v3451_v40  ;;  %v4355_v39 = vld [vmem:[#allocation10 + $0x290] sm:$0xf0]  ;;  %v4349_v19 = vld [vmem:[#allocation10 + $0x260] sm:$0xf0]  ;;  %v4346_v34 = vld [vmem:[#allocation10 + $0x248] sm:$0xf0] }
  0xfe   :  { %v3863_v54 = vor.u32 %v4355_v39, %v3862_v33  ;;  %v3839_v28 = vor.u32 %v4349_v19, %v3838_v18  ;;  %v3826_v33 = vld [vmem:[#allocation10 + $0x240] sm:$0xf]  ;;  %v3912_v39 = vld [vmem:[#allocation10 + $0x2f4] sm:$0xf0]  ;;  %v4339_v55 = vld [vmem:[#allocation10 + $0x214] sm:$0xf] }
  0xff   :  { %2208 = vmatpush.bf16.msrb.mxu0 %v3611_v36  ;;  %2222 = vmatpush.bf16.msrb.mxu1 %v3707_v37  ;;  %v676_v36 = vpop.f32.mrf.mxu3  ;;  %v683_v37 = vmax.f32 %v633_v20, 0.0  ;;  %v3539_v20 = vor.u32 %v4274_v62, %v3538_v59  ;;  %v3827_v49 = vor.u32 %v4346_v34, %v3826_v33  ;;  %v3804_v56 = vld [vmem:[#allocation10 + $0x21c] sm:$0xf0]  ;;  %v3588_v62 = vld [vmem:[#allocation10 + $0x6c] sm:$0xf0] }
 0x100   :  { %1519 = vmatmul.bf16.vlgmr.msra.gmra.mxu2 %v4787_v7  ;;  %1533 = vmatmul.bf16.vlgmr.msra.gmra.mxu3 %v4789_v8  ;;  %v647_v7 = vadd.f32 %v4799_v31, %v230_v0  ;;  %v635_v8 = vadd.f32 %v634_v5, %v229_v63  ;;  %v4331_v31 = vld [vmem:[#allocation10 + $0x1d0] sm:$0xf0]  ;;  %v677_v50 = vadd.f32 %v676_v36, %v232_v15  ;;  %v3634_v63 = vld [vmem:[#allocation10 + $0xc0] sm:$0xf]  ;;  %v4298_v0 = vld [vmem:[#allocation10 + $0xc8] sm:$0xf0] }
 0x101   :  { %2235 = vmatpush.bf16.msrb.mxu2 %v3815_v46  ;;  %2249 = vmatpush.bf16.msrb.mxu3 %v3911_v47  ;;  %v3550_v46 = vld [vmem:[#allocation10 + $0x18] sm:$0xf]  ;;  %v4277_v47 = vld [vmem:[#allocation10 + $0x20] sm:$0xf0]  ;;  %v3767_v53 = vor.u32 %v4331_v31, %v3766_v32  ;;  %v4342_v36 = vld [vmem:[#allocation10 + $0x22c] sm:$0xf] }
 0x102   :  { %v684_v38 = vmax.f32 %v647_v7, 0.0  ;;  %v691_v40 = vmax.f32 %v635_v8, 0.0  ;;  %v3551_v60 = vor.u32 %v4277_v47, %v3550_v46  ;;  %v3624_v5 = vld [vmem:[#allocation10 + $0xb4] sm:$0xf0]  ;;  %v3635_v7 = vor.u32 %v4298_v0, %v3634_v63  ;;  %v4333_v18 = vld [vmem:[#allocation10 + $0x1e4] sm:$0xf] }
 0x103   :  { %2209 = vmatpush.bf16.msrb.mxu0 %v3599_v51  ;;  %2223 = vmatpush.bf16.msrb.mxu1 %v3695_v52  ;;  %v685_v51 = vmax.f32 %v4811_v2, 0.0  ;;  %v686_v52 = vmax.f32 %v4813_v29, 0.0  ;;  %v3708_v2 = vld [vmem:[#allocation10 + $0x15c] sm:$0xf0]  ;;  %v3807_v63 = vor.u32 %v4339_v55, %v3804_v56  ;;  %v3780_v19 = vld [vmem:[#allocation10 + $0x1ec] sm:$0xf0] }
 0x104   :  { %v697_v57 = vpack.c.bf16 %v684_v38, %v683_v37  ;;  %v3730_v29 = vld [vmem:[#allocation10 + $0x180] sm:$0xf]  ;;  %v3816_v37 = vld [vmem:[#allocation10 + $0x234] sm:$0xf0]  ;;  %v4366_v38 = vld [vmem:[#allocation10 + $0x2ec] sm:$0xf] }
 0x105   :  { %2236 = vmatpush.bf16.msrb.mxu2 %v3803_v45  ;;  %2250 = vmatpush.bf16.msrb.mxu3 %v3899_v58  ;;  %v4352_v45 = vld [vmem:[#allocation10 + $0x278] sm:$0xf0]  ;;  %v701_v58 = vpack.c.bf16 %v692_v41, %v691_v40  ;;  %v698_v8 = vpack.c.bf16 %v686_v52, %v685_v51  ;;  %v3819_v51 = vor.u32 %v4342_v36, %v3816_v37  ;;  %v3552_v37 = vld [vmem:[#allocation10 + $0x24] sm:$0xf0]  ;;  %v3630_v55 = vld [vmem:[#allocation10 + $0xb0] sm:$0xf] }
 0x106   :  { %v3851_v9 = vor.u32 %v4352_v45, %v3850_v44  ;;  %v1680_v14 = vunpack.c.h.b16 %v697_v57  ;;  %v3915_v52 = vor.u32 %v4366_v38, %v3912_v39  ;;  %v3900_v44 = vld [vmem:[#allocation10 + $0x2dc] sm:$0xf0]  ;;  %v4276_v36 = vld [vmem:[#allocation10 + $0x1c] sm:$0xf] }
 0x107   :  { %2210 = vmatpush.bf16.msrb.mxu0 %v3587_v1  ;;  %2224 = vmatpush.bf16.msrb.mxu1 %v3683_v3  ;;  %v693_v1 = vmax.f32 %v663_v35, 0.0  ;;  %v694_v3 = vmax.f32 %v677_v50, 0.0  ;;  %v1683_v15 = vunpack.c.l.b16 %v701_v58  ;;  %v1684_v16 = vunpack.c.h.b16 %v701_v58  ;;  %v4288_v35 = vld [vmem:[#allocation10 + $0x7c] sm:$0xf]  ;;  %v3600_v50 = vld [vmem:[#allocation10 + $0x84] sm:$0xf0] }
 0x108   :  { %v1681_v40 = vunpack.c.l.b16 %v698_v8  ;;  %v1682_v46 = vunpack.c.h.b16 %v698_v8  ;;  %v3603_v58 = vor.u32 %v4288_v35, %v3600_v50  ;;  %v3540_v50 = vld [vmem:[#allocation10 + $0xc] sm:$0xf0]  ;;  %v4296_v56 = vld [vmem:[#allocation10 + $0xb8] sm:$0xf0] }
 0x109   :  { %2237 = vmatpush.bf16.msrb.mxu2 %v3791_v12  ;;  %2251 = vmatpush.bf16.msrb.mxu3 %v3887_v13  ;;  %v3742_v12 = vld [vmem:[#allocation10 + $0x198] sm:$0xf]  ;;  %v1679_v13 = vunpack.c.l.b16 %v697_v57  ;;  %v702_v21 = vpack.c.bf16 %v694_v3, %v693_v1  ;;  %v4819_v31 = vpack.c.b16 %v1684_v16, %v1680_v14  ;;  %v4363_v57 = vld [vmem:[#allocation10 + $0x2d4] sm:$0xf]  ;;  %v4309_v1 = vld [vmem:[#allocation10 + $0x124] sm:$0xf] }
 0x10a   :  { %v3743_v27 = vor.u32 %v4325_v17, %v3742_v12  ;;  %v3903_v0 = vor.u32 %v4363_v57, %v3900_v44  ;;  %v3684_v3 = vld [vmem:[#allocation10 + $0x12c] sm:$0xf0]  ;;  %v4282_v12 = vld [vmem:[#allocation10 + $0x4c] sm:$0xf]  ;;  %v3672_v17 = vld [vmem:[#allocation10 + $0x114] sm:$0xf0] }
 0x10b   :  { %2211 = vmatpush.bf16.msrb.mxu0 %v3575_v22  ;;  %2225 = vmatpush.bf16.msrb.mxu1 %v3671_v23  ;;  %v3627_v22 = vor.u32 %v4294_v4, %v3624_v5  ;;  %v3723_v23 = vor.u32 %v4318_v10, %v3720_v11  ;;  %v4817_v32 = vpack.c.b16 %v1683_v15, %v1679_v13  ;;  %v1685_v41 = vunpack.c.l.b16 %v702_v21  ;;  %v4336_v4 = vld [vmem:[#allocation10 + $0x1fc] sm:$0xf]  ;;  %v3792_v5 = vld [vmem:[#allocation10 + $0x204] sm:$0xf0]  ;;  %v3576_v13 = vld [vmem:[#allocation10 + $0x54] sm:$0xf0] }
 0x10c   :  { %v1686_v47 = vunpack.c.h.b16 %v702_v21  ;;  %v3687_v11 = vor.u32 %v4309_v1, %v3684_v3  ;;  %v3795_v14 = vor.u32 %v4336_v4, %v3792_v5  ;;  %v4306_v16 = vld [vmem:[#allocation10 + $0x10c] sm:$0xf]  ;;  %v3579_v8 = vor.u32 %v4282_v12, %v3576_v13  ;;  %v3726_v57 = vld [vmem:[#allocation10 + $0x170] sm:$0xf]  ;;  %v4320_v44 = vld [vmem:[#allocation10 + $0x178] sm:$0xf0] }
 0x10d   :  { %2238 = vmatpush.bf16.msrb.mxu2 %v3779_v25  ;;  %2252 = vmatpush.bf16.msrb.mxu3 %v3875_v30  ;;  %v3612_v25 = vld [vmem:[#allocation10 + $0x9c] sm:$0xf0]  ;;  %v4322_v30 = vld [vmem:[#allocation10 + $0x188] sm:$0xf0]  ;;  %v4823_v45 = vpack.c.b16 %v1685_v41, %v1681_v40  ;;  %v3675_v21 = vor.u32 %v4306_v16, %v3672_v17  ;;  %v4300_v40 = vld [vmem:[#allocation10 + $0xdc] sm:$0xf]  ;;  %v3631_v1 = vor.u32 %v4296_v56, %v3630_v55 }
 0x10e   :  { %v3731_v48 = vor.u32 %v4322_v30, %v3730_v29  ;;  %v4825_v59 = vpack.c.b16 %v1686_v47, %v1682_v46  ;;  %v4354_v29 = vld [vmem:[#allocation10 + $0x28c] sm:$0xf]  ;;  %v3864_v30 = vld [vmem:[#allocation10 + $0x294] sm:$0xf0]  ;;  %v3648_v41 = vld [vmem:[#allocation10 + $0xe4] sm:$0xf0]  ;;  %v3727_v4 = vor.u32 %v4320_v44, %v3726_v57 }
 0x10f   :  { %2212 = vmatpush.bf16.msrb.mxu0 %v3563_v42  ;;  %2226 = vmatpush.bf16.msrb.mxu1 %v3659_v43  ;;  %v3615_v42 = vor.u32 %v4291_v24, %v3612_v25  ;;  %v3711_v43 = vor.u32 %v4315_v26, %v3708_v2  ;;  %v3783_v24 = vor.u32 %v4333_v18, %v3780_v19  ;;  %v4303_v26 = vld [vmem:[#allocation10 + $0xf4] sm:$0xf]  ;;  %v3768_v2 = vld [vmem:[#allocation10 + $0x1d4] sm:$0xf0]  ;;  %v3852_v47 = vld [vmem:[#allocation10 + $0x27c] sm:$0xf0] }
 0x110   :  { %v3867_v39 = vor.u32 %v4354_v29, %v3864_v30  ;;  %v4351_v46 = vld [vmem:[#allocation10 + $0x274] sm:$0xf]  ;;  %v3651_v35 = vor.u32 %v4300_v40, %v3648_v41  ;;  %v3618_v3 = vld [vmem:[#allocation10 + $0x98] sm:$0xf]  ;;  %v4321_v12 = vld [vmem:[#allocation10 + $0x184] sm:$0xf] }
 0x111   :  { %2239 = vmatpush.bf16.msrb.mxu2 %v3767_v53  ;;  %2253 = vmatpush.bf16.msrb.mxu3 %v3863_v54  ;;  %v4312_v53 = vld [vmem:[#allocation10 + $0x13c] sm:$0xf]  ;;  %v3696_v54 = vld [vmem:[#allocation10 + $0x144] sm:$0xf0]  ;;  %v3732_v13 = vld [vmem:[#allocation10 + $0x18c] sm:$0xf0] }
 0x112   :  { %v3822_v16 = vld [vmem:[#allocation10 + $0x230] sm:$0xf]  ;;  %v4344_v17 = vld [vmem:[#allocation10 + $0x238] sm:$0xf0]  ;;  %v3906_v30 = vld [vmem:[#allocation10 + $0x2d8] sm:$0xf] }
 0x113   :  { %2213 = vmatpush.bf16.msrb.mxu0 %v3551_v60  ;;  %2227 = vmatpush.bf16.msrb.mxu1 %v3647_v61  ;;  %v3699_v60 = vor.u32 %v4312_v53, %v3696_v54  ;;  %v4285_v61 = vld [vmem:[#allocation10 + $0x64] sm:$0xf]  ;;  %v3855_v54 = vor.u32 %v4351_v46, %v3852_v47  ;;  %v3918_v19 = vld [vmem:[#allocation10 + $0x2f0] sm:$0xf]  ;;  %v4311_v40 = vld [vmem:[#allocation10 + $0x130] sm:$0xf0] }
 0x114   :  { %v3591_v10 = vor.u32 %v4285_v61, %v3588_v62  ;;  %v4348_v62 = vld [vmem:[#allocation10 + $0x25c] sm:$0xf]  ;;  %v3894_v47 = vld [vmem:[#allocation10 + $0x2c0] sm:$0xf]  ;;  %v3786_v55 = vld [vmem:[#allocation10 + $0x1e8] sm:$0xf] }
 0x115   :  { %2240 = vmatpush.bf16.msrb.mxu2 %v3755_v6  ;;  %2254 = vmatpush.bf16.msrb.mxu3 %v3851_v9  ;;  %v4360_v6 = vld [vmem:[#allocation10 + $0x2bc] sm:$0xf]  ;;  %v3888_v9 = vld [vmem:[#allocation10 + $0x2c4] sm:$0xf0]  ;;  %v4335_v56 = vld [vmem:[#allocation10 + $0x1f0] sm:$0xf0] }
 0x116   :  { %v3891_v15 = vor.u32 %v4360_v6, %v3888_v9  ;;  %v4293_v6 = vld [vmem:[#allocation10 + $0xa0] sm:$0xf0]  ;;  %v3714_v9 = vld [vmem:[#allocation10 + $0x158] sm:$0xf]  ;;  %v3882_v44 = vld [vmem:[#allocation10 + $0x2a8] sm:$0xf] }
 0x117   :  { %2214 = vmatpush.bf16.msrb.mxu0 %v3539_v20  ;;  %2228 = vmatpush.bf16.msrb.mxu1 %v3635_v7  ;;  %v4357_v20 = vld [vmem:[#allocation10 + $0x2a4] sm:$0xf]  ;;  %v3876_v7 = vld [vmem:[#allocation10 + $0x2ac] sm:$0xf0]  ;;  %v3619_v18 = vor.u32 %v4293_v6, %v3618_v3 }
 0x118   :  { %v3879_v25 = vor.u32 %v4357_v20, %v3876_v7  ;;  %v4368_v20 = vld [vmem:[#allocation10 + $0x2f8] sm:$0xf0] }
 0x119   :  { %2241 = vmatpush.bf16.msrb.mxu2 %v3743_v27  ;;  %2255 = vmatpush.bf16.msrb.mxu3 %v3839_v28  ;;  %v3660_v27 = vld [vmem:[#allocation10 + $0xfc] sm:$0xf0]  ;;  %v4330_v28 = vld [vmem:[#allocation10 + $0x1cc] sm:$0xf] }
 0x11a   :  { %2215 = vmatmul.bf16.vlgmr.msrb.gmra.mxu0 %v4817_v32  ;;  %2229 = vmatmul.bf16.vlgmr.msrb.gmra.mxu1 %v4819_v31  ;;  %v3663_v34 = vor.u32 %v4303_v26, %v3660_v27  ;;  %v3771_v38 = vor.u32 %v4330_v28, %v3768_v2  ;;  %v4314_v26 = vld [vmem:[#allocation10 + $0x148] sm:$0xf0]  ;;  %v3919_v27 = vor.u32 %v4368_v20, %v3918_v19  ;;  %v3810_v28 = vld [vmem:[#allocation10 + $0x218] sm:$0xf]  ;;  %v4341_v2 = vld [vmem:[#allocation10 + $0x220] sm:$0xf0] }
 0x11b   :  { %2263 = vmatpush.bf16.msra.mxu0 %v3627_v22  ;;  %2277 = vmatpush.bf16.msra.mxu1 %v3723_v23  ;;  %v4279_v22 = vld [vmem:[#allocation10 + $0x34] sm:$0xf]  ;;  %v3564_v23 = vld [vmem:[#allocation10 + $0x3c] sm:$0xf0]  ;;  %v4329_v19 = vld [vmem:[#allocation10 + $0x1c0] sm:$0xf0] }
 0x11c   :  { %v3567_v33 = vor.u32 %v4279_v22, %v3564_v23  ;;  %v4290_v22 = vld [vmem:[#allocation10 + $0x88] sm:$0xf0] }
 0x11d   :  { %2242 = vmatpush.bf16.msrb.mxu2 %v3731_v48  ;;  %2256 = vmatpush.bf16.msrb.mxu3 %v3827_v49  ;;  %v3555_v48 = vor.u32 %v4276_v36, %v3552_v37  ;;  %v4273_v49 = vld [vmem:[#allocation10 + $0x4] sm:$0xf]  ;;  %v3594_v36 = vld [vmem:[#allocation10 + $0x68] sm:$0xf]  ;;  %v4287_v37 = vld [vmem:[#allocation10 + $0x70] sm:$0xf0] }
 0x11e   :  { %v3543_v61 = vor.u32 %v4273_v49, %v3540_v50  ;;  %v3595_v46 = vor.u32 %v4287_v37, %v3594_v36  ;;  %v4284_v50 = vld [vmem:[#allocation10 + $0x58] sm:$0xf0] }
 0x11f   :  { %2264 = vmatpush.bf16.msra.mxu0 %v3615_v42  ;;  %2278 = vmatpush.bf16.msra.mxu1 %v3711_v43  ;;  %v4327_v42 = vld [vmem:[#allocation10 + $0x1b4] sm:$0xf]  ;;  %v3756_v43 = vld [vmem:[#allocation10 + $0x1bc] sm:$0xf0] }
 0x120   :  { %2243 = vmatmul.bf16.vlgmr.msrb.gmra.mxu2 %v4823_v45  ;;  %2257 = vmatmul.bf16.vlgmr.msrb.gmra.mxu3 %v4825_v59  ;;  %v3759_v53 = vor.u32 %v4327_v42, %v3756_v43  ;;  %v3798_v42 = vld [vmem:[#allocation10 + $0x200] sm:$0xf]  ;;  %v4338_v43 = vld [vmem:[#allocation10 + $0x208] sm:$0xf0] }
 0x121   :  { %2291 = vmatpush.bf16.msra.mxu2 %v3819_v51  ;;  %2305 = vmatpush.bf16.msra.mxu3 %v3915_v52  ;;  %v4297_v51 = vld [vmem:[#allocation10 + $0xc4] sm:$0xf]  ;;  %v3636_v52 = vld [vmem:[#allocation10 + $0xcc] sm:$0xf0] }
 0x123   :  { %2265 = vmatpush.bf16.msra.mxu0 %v3603_v58  ;;  %2279 = vmatpush.bf16.msra.mxu1 %v3699_v60  ;;  %v4324_v58 = vld [vmem:[#allocation10 + $0x19c] sm:$0xf]  ;;  %v3744_v60 = vld [vmem:[#allocation10 + $0x1a4] sm:$0xf0] }
 0x124   :  { %v3747_v5 = vor.u32 %v4324_v58, %v3744_v60  ;;  %v4359_v58 = vld [vmem:[#allocation10 + $0x2b0] sm:$0xf0] }
 0x125   :  { %2292 = vmatpush.bf16.msra.mxu2 %v3807_v63  ;;  %2306 = vmatpush.bf16.msra.mxu3 %v3903_v0  ;;  %v3840_v63 = vld [vmem:[#allocation10 + $0x264] sm:$0xf0]  ;;  %v3639_v0 = vor.u32 %v4297_v51, %v3636_v52  ;;  %v3799_v51 = vor.u32 %v4338_v43, %v3798_v42  ;;  %v3678_v52 = vld [vmem:[#allocation10 + $0x110] sm:$0xf]  ;;  %v3883_v3 = vor.u32 %v4359_v58, %v3882_v44  ;;  %v4371_v44 = vld [vmem:[#allocation13 + $0x10] sm:$0xff] }
 0x127   :  { %2266 = vmatpush.bf16.msra.mxu0 %v3591_v10  ;;  %2280 = vmatpush.bf16.msra.mxu1 %v3687_v11  ;;  %v4317_v10 = vld [vmem:[#allocation10 + $0x160] sm:$0xf0]  ;;  %v3843_v11 = vor.u32 %v4348_v62, %v3840_v63  ;;  %v3787_v63 = vor.u32 %v4335_v56, %v3786_v55  ;;  %v4400_v56 = vld [vmem:[#allocation14 + $0x38] sm:$0xff] }
 0x128   :  { %v3715_v7 = vor.u32 %v4317_v10, %v3714_v9  ;;  %v4281_v62 = vld [vmem:[#allocation10 + $0x40] sm:$0xf0]  ;;  %v3870_v9 = vld [vmem:[#allocation10 + $0x290] sm:$0xf]  ;;  %v4356_v10 = vld [vmem:[#allocation10 + $0x298] sm:$0xf0] }
 0x129   :  { %2293 = vmatpush.bf16.msra.mxu2 %v3795_v14  ;;  %2307 = vmatpush.bf16.msra.mxu3 %v3891_v15  ;;  %v4345_v14 = vld [vmem:[#allocation10 + $0x244] sm:$0xf]  ;;  %v3828_v15 = vld [vmem:[#allocation10 + $0x24c] sm:$0xf0] }
 0x12a   :  { %v3831_v23 = vor.u32 %v4345_v14, %v3828_v15  ;;  %v3654_v15 = vld [vmem:[#allocation10 + $0xe0] sm:$0xf] }
 0x12b   :  { %2267 = vmatpush.bf16.msra.mxu0 %v3579_v8  ;;  %2281 = vmatpush.bf16.msra.mxu1 %v3675_v21  ;;  %v3735_v8 = vor.u32 %v4321_v12, %v3732_v13  ;;  %v3606_v21 = vld [vmem:[#allocation10 + $0x80] sm:$0xf]  ;;  %v4278_v13 = vld [vmem:[#allocation10 + $0x28] sm:$0xf0] }
 0x12c   :  { %v3607_v29 = vor.u32 %v4290_v22, %v3606_v21  ;;  %v3558_v12 = vld [vmem:[#allocation10 + $0x20] sm:$0xf]  ;;  %v3546_v22 = vld [vmem:[#allocation10 + $0x8] sm:$0xf] }
 0x12d   :  { %2294 = vmatpush.bf16.msra.mxu2 %v3783_v24  ;;  %2308 = vmatpush.bf16.msra.mxu3 %v3879_v25  ;;  %v3823_v24 = vor.u32 %v4344_v17, %v3822_v16  ;;  %v3702_v25 = vld [vmem:[#allocation10 + $0x140] sm:$0xf]  ;;  %v4302_v16 = vld [vmem:[#allocation10 + $0xe8] sm:$0xf0]  ;;  %v3871_v17 = vor.u32 %v4356_v10, %v3870_v9  ;;  %v3559_v20 = vor.u32 %v4278_v13, %v3558_v12  ;;  %v4369_v10 = vld [vmem:[#allocation13] sm:$0xff] }
 0x12e   :  { %v3655_v21 = vor.u32 %v4302_v16, %v3654_v15  ;;  %v4397_v15 = vld [vmem:[#allocation14 + $0x20] sm:$0xff] }
 0x12f   :  { %2268 = vmatpush.bf16.msra.mxu0 %v3567_v33  ;;  %2282 = vmatpush.bf16.msra.mxu1 %v3663_v34  ;;  %v4365_v33 = vld [vmem:[#allocation10 + $0x2e0] sm:$0xf0]  ;;  %v3703_v34 = vor.u32 %v4314_v26, %v3702_v25  ;;  %v3642_v25 = vld [vmem:[#allocation10 + $0xc8] sm:$0xf]  ;;  %v4299_v26 = vld [vmem:[#allocation10 + $0xd0] sm:$0xf0] }
 0x130   :  { %v3907_v41 = vor.u32 %v4365_v33, %v3906_v30  ;;  %v3846_v30 = vld [vmem:[#allocation10 + $0x260] sm:$0xf]  ;;  %v4350_v33 = vld [vmem:[#allocation10 + $0x268] sm:$0xf0] }
 0x131   :  { %2295 = vmatpush.bf16.msra.mxu2 %v3771_v38  ;;  %2309 = vmatpush.bf16.msra.mxu3 %v3867_v39  ;;  %v3811_v38 = vor.u32 %v4341_v2, %v3810_v28  ;;  %v3690_v39 = vld [vmem:[#allocation10 + $0x128] sm:$0xf]  ;;  %v3750_v28 = vld [vmem:[#allocation10 + $0x1a0] sm:$0xf]  ;;  %v4326_v2 = vld [vmem:[#allocation10 + $0x1a8] sm:$0xf0]  ;;  %v3847_v37 = vor.u32 %v4350_v33, %v3846_v30 }
 0x132   :  { %v3691_v49 = vor.u32 %v4311_v40, %v3690_v39  ;;  %v3751_v36 = vor.u32 %v4326_v2, %v3750_v28  ;;  %v4323_v39 = vld [vmem:[#allocation10 + $0x190] sm:$0xf0]  ;;  %v3834_v40 = vld [vmem:[#allocation10 + $0x248] sm:$0xf]  ;;  %v4408_v28 = vld [vmem:[#allocation14 + $0x78] sm:$0xff] }
 0x133   :  { %2269 = vmatpush.bf16.msra.mxu0 %v3555_v48  ;;  %2283 = vmatpush.bf16.msra.mxu1 %v3651_v35  ;;  %v4362_v48 = vld [vmem:[#allocation10 + $0x2c8] sm:$0xf0]  ;;  %v3582_v35 = vld [vmem:[#allocation10 + $0x50] sm:$0xf]  ;;  %v4384_v2 = vld [vmem:[#allocation13 + $0x78] sm:$0xff] }
 0x134   :  { %v3583_v57 = vor.u32 %v4284_v50, %v3582_v35  ;;  %v4374_v35 = vld [vmem:[#allocation13 + $0x28] sm:$0xff] }
 0x135   :  { %2296 = vmatpush.bf16.msra.mxu2 %v3759_v53  ;;  %2310 = vmatpush.bf16.msra.mxu3 %v3855_v54  ;;  %v4308_v53 = vld [vmem:[#allocation10 + $0x118] sm:$0xf0]  ;;  %v3895_v54 = vor.u32 %v4362_v48, %v3894_v47 }
 0x136   :  { %v3679_v60 = vor.u32 %v4308_v53, %v3678_v52  ;;  %v4373_v52 = vld [vmem:[#allocation13 + $0x20] sm:$0xff] }
 0x137   :  { %2270 = vmatpush.bf16.msra.mxu0 %v3543_v61  ;;  %2284 = vmatpush.bf16.msra.mxu1 %v3639_v0  ;;  %v3570_v61 = vld [vmem:[#allocation10 + $0x38] sm:$0xf] }
 0x138   :  { %v3666_v0 = vld [vmem:[#allocation10 + $0xf8] sm:$0xf]  ;;  %v3571_v6 = vor.u32 %v4281_v62, %v3570_v61 }
 0x139   :  { %2297 = vmatpush.bf16.msra.mxu2 %v3747_v5  ;;  %2311 = vmatpush.bf16.msra.mxu3 %v3843_v11  ;;  %v4332_v5 = vld [vmem:[#allocation10 + $0x1d8] sm:$0xf0]  ;;  %v4399_v62 = vld [vmem:[#allocation14 + $0x30] sm:$0xff] }
 0x13a   :  { %2271 = vmatmul.bf16.vlgmr.msra.gmra.mxu0 %v4817_v32  ;;  %2285 = vmatmul.bf16.vlgmr.msra.gmra.mxu1 %v4819_v31 }
 0x13b   :  { %2319 = vmatpush.bf16.msrb.mxu0 %v3631_v1  ;;  %2333 = vmatpush.bf16.msrb.mxu1 %v3727_v4  ;;  %v4305_v1 = vld [vmem:[#allocation10 + $0x100] sm:$0xf0]  ;;  %v3774_v4 = vld [vmem:[#allocation10 + $0x1d0] sm:$0xf] }
 0x13c   :  { %v3667_v11 = vor.u32 %v4305_v1, %v3666_v0  ;;  %v3775_v14 = vor.u32 %v4332_v5, %v3774_v4  ;;  %v4370_v0 = vld [vmem:[#allocation13 + $0x8] sm:$0xff] }
 0x13d   :  { %2298 = vmatpush.bf16.msra.mxu2 %v3735_v8  ;;  %2312 = vmatpush.bf16.msra.mxu3 %v3831_v23  ;;  %v4353_v8 = vld [vmem:[#allocation10 + $0x280] sm:$0xf0]  ;;  %v4275_v23 = vld [vmem:[#allocation10 + $0x10] sm:$0xf0] }
 0x13f   :  { %2320 = vmatpush.bf16.msrb.mxu0 %v3619_v18  ;;  %2334 = vmatpush.bf16.msrb.mxu1 %v3715_v7  ;;  %v3762_v18 = vld [vmem:[#allocation10 + $0x1b8] sm:$0xf] }
 0x140   :  { %2299 = vmatmul.bf16.vlgmr.msra.gmra.mxu2 %v4823_v45  ;;  %2313 = vmatmul.bf16.vlgmr.msra.gmra.mxu3 %v4825_v59  ;;  %v3858_v7 = vld [vmem:[#allocation10 + $0x278] sm:$0xf] }
 0x141   :  { %2347 = vmatpush.bf16.msrb.mxu2 %v3823_v24  ;;  %2361 = vmatpush.bf16.msrb.mxu3 %v3919_v27  ;;  %v3763_v24 = vor.u32 %v4329_v19, %v3762_v18  ;;  %v3859_v27 = vor.u32 %v4353_v8, %v3858_v7  ;;  %v4396_v19 = vld [vmem:[#allocation14 + $0x18] sm:$0xff]  ;;  %v4395_v7 = vld [vmem:[#allocation14 + $0x10] sm:$0xff] }
 0x143   :  { %2321 = vmatpush.bf16.msrb.mxu0 %v3607_v29  ;;  %2335 = vmatpush.bf16.msrb.mxu1 %v3703_v34  ;;  %v3547_v29 = vor.u32 %v4275_v23, %v3546_v22  ;;  %v3643_v34 = vor.u32 %v4299_v26, %v3642_v25 }
 0x145   :  { %2348 = vmatpush.bf16.msrb.mxu2 %v3811_v38  ;;  %2362 = vmatpush.bf16.msrb.mxu3 %v3907_v41  ;;  %v3738_v38 = vld [vmem:[#allocation10 + $0x188] sm:$0xf]  ;;  %v4347_v41 = vld [vmem:[#allocation10 + $0x250] sm:$0xf0] }
 0x146   :  { %v3739_v42 = vor.u32 %v4323_v39, %v3738_v38  ;;  %v3835_v43 = vor.u32 %v4347_v41, %v3834_v40  ;;  %v4406_v40 = vld [vmem:[#allocation14 + $0x68] sm:$0xff] }
 0x147   :  { %2322 = vmatpush.bf16.msrb.mxu0 %v3595_v46  ;;  %2336 = vmatpush.bf16.msrb.mxu1 %v3691_v49  ;;  %v4376_v46 = vld [vmem:[#allocation13 + $0x38] sm:$0xff]  ;;  %v4375_v49 = vld [vmem:[#allocation13 + $0x30] sm:$0xff]  ;;  %v4382_v41 = vld [vmem:[#allocation13 + $0x68] sm:$0xff] }
 0x149   :  { %2349 = vmatpush.bf16.msrb.mxu2 %v3799_v51  ;;  %2363 = vmatpush.bf16.msrb.mxu3 %v3895_v54  ;;  %v4372_v54 = vld [vmem:[#allocation13 + $0x18] sm:$0xff] }
 0x14b   :  { %2323 = vmatpush.bf16.msrb.mxu0 %v3583_v57  ;;  %2337 = vmatpush.bf16.msrb.mxu1 %v3679_v60 }
 0x14d   :  { %2350 = vmatpush.bf16.msrb.mxu2 %v3787_v63  ;;  %2364 = vmatpush.bf16.msrb.mxu3 %v3883_v3 }
 0x14f   :  { %2324 = vmatpush.bf16.msrb.mxu0 %v3571_v6  ;;  %2338 = vmatpush.bf16.msrb.mxu1 %v3667_v11  ;;  %v4398_v6 = vld [vmem:[#allocation14 + $0x28] sm:$0xff] }
 0x151   :  { %2351 = vmatpush.bf16.msrb.mxu2 %v3775_v14  ;;  %2365 = vmatpush.bf16.msrb.mxu3 %v3871_v17 }
 0x153   :  { %2325 = vmatpush.bf16.msrb.mxu0 %v3559_v20  ;;  %2339 = vmatpush.bf16.msrb.mxu1 %v3655_v21 }
 0x155   :  { %2352 = vmatpush.bf16.msrb.mxu2 %v3763_v24  ;;  %2366 = vmatpush.bf16.msrb.mxu3 %v3859_v27  ;;  %v4394_v24 = vld [vmem:[#allocation14 + $0x8] sm:$0xff]  ;;  %v4393_v27 = vld [vmem:[#allocation14] sm:$0xff] }
 0x156   :  { %v1380_v47 = vpop.f32.mrf.mxu0  ;;  %v1394_v48 = vpop.f32.mrf.mxu1 }
 0x157   :  { %2326 = vmatpush.bf16.msrb.mxu0 %v3547_v29  ;;  %2340 = vmatpush.bf16.msrb.mxu1 %v3643_v34 }
 0x159   :  { %2353 = vmatpush.bf16.msrb.mxu2 %v3751_v36  ;;  %2367 = vmatpush.bf16.msrb.mxu3 %v3847_v37  ;;  %v4407_v36 = vld [vmem:[#allocation14 + $0x70] sm:$0xff] }
 0x15a   :  { %2327 = vmatmul.bf16.vlgmr.msrb.gmra.mxu0 %v4817_v32  ;;  %2341 = vmatmul.bf16.vlgmr.msrb.gmra.mxu1 %v4819_v31  ;;  %v4840_v32 = vld [vmem:[%s4887_s4] sm:$0x7]  ;;  %v4383_v37 = vld [vmem:[#allocation13 + $0x70] sm:$0xff] }
 0x15b   :  { %v833_v31 = vperm.slane %v4840_v32, 0  ;;  %2633 = vmatpush.bf16.msra.mxu0 %v4400_v56  ;;  %v835_v20 = vperm.slane %v4840_v32, 2  ;;  %2647 = vmatpush.bf16.msra.mxu1 %v4408_v28  ;;  %v4403_v56 = vld [vmem:[#allocation14 + $0x50] sm:$0xff]  ;;  %v4416_v28 = vld [vmem:[#allocation14 + $0xb8] sm:$0xff] }
 0x15d   :  { %2354 = vmatpush.bf16.msrb.mxu2 %v3739_v42  ;;  %2368 = vmatpush.bf16.msrb.mxu3 %v3835_v43  ;;  %v1381_v53 = vadd.f32 %v1380_v47, %v833_v31 }
 0x15e   :  { %v1382_v50 = vpop.f32.mrf.mxu0  ;;  %v1396_v51 = vpop.f32.mrf.mxu1 }
 0x15f   :  { %v1383_v57 = vadd.f32 %v1382_v50, %v833_v31  ;;  %2634 = vmatpush.bf16.msra.mxu0 %v4399_v62  ;;  %2648 = vmatpush.bf16.msra.mxu1 %v4407_v36  ;;  %v4378_v62 = vld [vmem:[#allocation13 + $0x48] sm:$0xff]  ;;  %v4415_v36 = vld [vmem:[#allocation14 + $0xb0] sm:$0xff] }
 0x160   :  { %2355 = vmatmul.bf16.vlgmr.msrb.gmra.mxu2 %v4823_v45  ;;  %2369 = vmatmul.bf16.vlgmr.msrb.gmra.mxu3 %v4825_v59  ;;  %v1395_v59 = vadd.f32 %v1394_v48, %v1381_v53  ;;  %v4405_v48 = vld [vmem:[#allocation14 + $0x60] sm:$0xff]  ;;  %v4380_v53 = vld [vmem:[#allocation13 + $0x58] sm:$0xff] }
 0x161   :  { %2819 = vmatpush.bf16.msra.mxu3 %v4376_v46  ;;  %v1397_v63 = vadd.f32 %v1396_v51, %v1383_v57  ;;  %2661 = vmatpush.bf16.msra.mxu2 %v4416_v28 }
 0x163   :  { %v1408_v55 = vpop.f32.mrf.mxu2  ;;  %v1422_v45 = vpop.f32.mrf.mxu3  ;;  %2635 = vmatpush.bf16.msra.mxu0 %v4398_v6  ;;  %2649 = vmatpush.bf16.msra.mxu1 %v4406_v40 }
 0x164   :  { %v1409_v61 = vadd.f32 %v1408_v55, %v1395_v59  ;;  %v4862_v55 = vld [vmem:[#allocation11] sm:$0x7]  ;;  %v4379_v59 = vld [vmem:[#allocation13 + $0x50] sm:$0xff] }
 0x165   :  { %2820 = vmatpush.bf16.msra.mxu3 %v4375_v49  ;;  %v4381_v49 = vld [vmem:[#allocation13 + $0x60] sm:$0xff]  ;;  %v1669_v57 = vperm.slane %v4862_v55, 0  ;;  %2662 = vmatpush.bf16.msra.mxu2 %v4415_v36 }
 0x166   :  { %v1423_v4 = vadd.f32 %v1422_v45, %v1409_v61  ;;  %v4402_v61 = vld [vmem:[#allocation14 + $0x48] sm:$0xff] }
 0x167   :  { %v4843_v58 = vpop.f32.mrf.mxu0  ;;  %v4845_v60 = vpop.f32.mrf.mxu1  ;;  %2636 = vmatpush.bf16.msra.mxu0 %v4397_v15  ;;  %2650 = vmatpush.bf16.msra.mxu1 %v4405_v48  ;;  %v4385_v48 = vld [vmem:[#allocation13 + $0x80] sm:$0xff] }
 0x168   :  { %v2375_v13 = vmax.f32 %v1423_v4, 0.0  ;;  %v4392_v4 = vld [vmem:[#allocation13 + $0xb8] sm:$0xff] }
 0x169   :  { %2821 = vmatpush.bf16.msra.mxu3 %v4374_v35 }
 0x16b   :  { %v1410_v1 = vpop.f32.mrf.mxu2  ;;  %v1424_v3 = vpop.f32.mrf.mxu3  ;;  %2637 = vmatpush.bf16.msra.mxu0 %v4396_v19  ;;  %v4390_v19 = vld [vmem:[#allocation13 + $0xa8] sm:$0xff] }
 0x16c   :  { %v1411_v5 = vadd.f32 %v1410_v1, %v1397_v63  ;;  %v4377_v1 = vld [vmem:[#allocation13 + $0x40] sm:$0xff] }
 0x16d   :  { %2822 = vmatpush.bf16.msra.mxu3 %v4373_v52  ;;  %v4404_v52 = vld [vmem:[#allocation14 + $0x58] sm:$0xff] }
 0x16e   :  { %v1425_v9 = vadd.f32 %v1424_v3, %v1411_v5  ;;  %2651 = vmatpush.bf16.msra.mxu1 %v4404_v52 }
 0x16f   :  { %v4847_v11 = vpop.f32.mrf.mxu0  ;;  %v4849_v12 = vpop.f32.mrf.mxu1  ;;  %2638 = vmatpush.bf16.msra.mxu0 %v4395_v7 }
 0x170   :  { %v2378_v14 = vmax.f32 %v1425_v9, 0.0 }
 0x171   :  { %2823 = vmatpush.bf16.msra.mxu3 %v4372_v54 }
 0x172   :  { %v2381_v16 = vpack.c.bf16 %v2378_v14, %v2375_v13  ;;  %2652 = vmatpush.bf16.msra.mxu1 %v4403_v56  ;;  %v4391_v14 = vld [vmem:[#allocation13 + $0xb0] sm:$0xff]  ;;  %v4410_v56 = vld [vmem:[#allocation14 + $0x88] sm:$0xff] }
 0x173   :  { %v4851_v17 = vpop.f32.mrf.mxu2  ;;  %v4853_v18 = vpop.f32.mrf.mxu3  ;;  %2639 = vmatpush.bf16.msra.mxu0 %v4394_v24 }
 0x175   :  { %2824 = vmatpush.bf16.msra.mxu3 %v4371_v44 }
 0x176   :  { %2653 = vmatpush.bf16.msra.mxu1 %v4402_v61 }
 0x177   :  { %v1492_v8 = vpop.f32.mrf.mxu0  ;;  %v1506_v22 = vpop.f32.mrf.mxu1  ;;  %2640 = vmatpush.bf16.msra.mxu0 %v4393_v27 }
 0x178   :  { %v1493_v21 = vadd.f32 %v1492_v8, %v835_v20 }
 0x179   :  { %2825 = vmatpush.bf16.msra.mxu3 %v4370_v0  ;;  %v4401_v0 = vld [vmem:[#allocation14 + $0x40] sm:$0xff] }
 0x17a   :  { %v1507_v23 = vadd.f32 %v1506_v22, %v1493_v21  ;;  %2654 = vmatpush.bf16.msra.mxu1 %v4401_v0  ;;  %v4389_v22 = vld [vmem:[#allocation13 + $0xa0] sm:$0xff] }
 0x17b   :  { %v4856_v25 = vpop.f32.mrf.mxu2  ;;  %v4858_v26 = vpop.f32.mrf.mxu3  ;;  %2833 = vmatpush.bf16.msrb.mxu0 %v4384_v2 }
 0x17d   :  { %2826 = vmatpush.bf16.msra.mxu3 %v4369_v10 }
 0x17e   :  { %2847 = vmatpush.bf16.msrb.mxu1 %v4392_v4 }
 0x17f   :  { %v1494_v29 = vpop.f32.mrf.mxu0  ;;  %2834 = vmatpush.bf16.msrb.mxu0 %v4383_v37  ;;  %v1508_v42 = vpop.f32.mrf.mxu1 }
 0x180   :  { %2827 = vmatmul.bf16.vlgmr.msra.gmra.mxu3 %v2381_v16  ;;  %v1495_v38 = vadd.f32 %v1494_v29, %v835_v20 }
 0x182   :  { %v1509_v43 = vadd.f32 %v1508_v42, %v1495_v38  ;;  %2848 = vmatpush.bf16.msrb.mxu1 %v4391_v14  ;;  %v4387_v38 = vld [vmem:[#allocation13 + $0x90] sm:$0xff]  ;;  %v4386_v42 = vld [vmem:[#allocation13 + $0x88] sm:$0xff] }
 0x183   :  { %v1520_v30 = vpop.f32.mrf.mxu2  ;;  %v1534_v33 = vpop.f32.mrf.mxu3  ;;  %2835 = vmatpush.bf16.msrb.mxu0 %v4382_v41 }
 0x184   :  { %v1521_v34 = vadd.f32 %v1520_v30, %v1507_v23  ;;  %v834_v23 = vperm.slane %v4840_v32, 1  ;;  %v4388_v30 = vld [vmem:[#allocation13 + $0x98] sm:$0xff]  ;;  %v4414_v32 = vld [vmem:[#allocation14 + $0xa8] sm:$0xff] }
 0x185   :  { %2663 = vmatpush.bf16.msra.mxu2 %v4414_v32 }
 0x186   :  { %v1535_v39 = vadd.f32 %v1534_v33, %v1521_v34  ;;  %2849 = vmatpush.bf16.msrb.mxu1 %v4390_v19  ;;  %v1439_v2 = vadd.f32 %v4847_v11, %v834_v23  ;;  %v1437_v33 = vadd.f32 %v4843_v58, %v834_v23 }
 0x187   :  { %2836 = vmatpush.bf16.msrb.mxu0 %v4381_v49  ;;  %v4412_v49 = vld [vmem:[#allocation14 + $0x98] sm:$0xff] }
 0x188   :  { %v2377_v50 = vmax.f32 %v1535_v39, 0.0  ;;  %v1453_v37 = vadd.f32 %v4849_v12, %v1439_v2  ;;  %v1451_v39 = vadd.f32 %v4845_v60, %v1437_v33 }
 0x18a   :  { %2850 = vmatpush.bf16.msrb.mxu1 %v4389_v22  ;;  %v1467_v40 = vadd.f32 %v4856_v25, %v1453_v37  ;;  %v1465_v11 = vadd.f32 %v4851_v17, %v1451_v39 }
 0x18b   :  { %v1522_v46 = vpop.f32.mrf.mxu2  ;;  %v1536_v35 = vpop.f32.mrf.mxu3  ;;  %2837 = vmatpush.bf16.msrb.mxu0 %v4380_v53 }
 0x18c   :  { %v1523_v47 = vadd.f32 %v1522_v46, %v1509_v43  ;;  %v1481_v58 = vadd.f32 %v4858_v26, %v1467_v40  ;;  %v4413_v43 = vld [vmem:[#allocation14 + $0xa0] sm:$0xff]  ;;  %v1670_v46 = vperm.slane %v4862_v55, 1  ;;  %v1479_v12 = vadd.f32 %v4853_v18, %v1465_v11  ;;  %v4411_v26 = vld [vmem:[#allocation14 + $0x90] sm:$0xff]  ;;  %v4434_v11 = vld [vmem:[%s4892_s9] ss:$0 sm:$0xff]  ;;  %s4678_s9 = smov 128  }
 0x18d   :  { %2664 = vmatpush.bf16.msra.mxu2 %v4413_v43 }
 0x18e   :  { %v1537_v31 = vadd.f32 %v1536_v35, %v1523_v47  ;;  %2851 = vmatpush.bf16.msrb.mxu1 %v4388_v30  ;;  %v2379_v60 = vmax.f32 %v1481_v58, 0.0  ;;  %v2376_v35 = vmax.f32 %v1479_v12, 0.0 }
 0x18f   :  { %2838 = vmatpush.bf16.msrb.mxu0 %v4379_v59 }
 0x190   :  { %v2380_v51 = vmax.f32 %v1537_v31, 0.0 }
 0x191   :  { %2665 = vmatpush.bf16.msra.mxu2 %v4412_v49 }
 0x192   :  { %v4860_v54 = vpack.c.bf16 %v2380_v51, %v2377_v50  ;;  %2852 = vmatpush.bf16.msrb.mxu1 %v4387_v38  ;;  %v2382_v51 = vpack.c.bf16 %v2379_v60, %v2376_v35 }
 0x193   :  { %2839 = vmatpush.bf16.msrb.mxu0 %v4378_v62 }
 0x195   :  { %2666 = vmatpush.bf16.msra.mxu2 %v4411_v26 }
 0x196   :  { %2853 = vmatpush.bf16.msrb.mxu1 %v4386_v42 }
 0x197   :  { %v2216_v45 = vpop.f32.mrf.mxu0  ;;  %v2230_v44 = vpop.f32.mrf.mxu1  ;;  %2840 = vmatpush.bf16.msrb.mxu0 %v4377_v1 }
 0x198   :  { %v2217_v63 = vadd.f32 %v2216_v45, %v1669_v57 }
 0x199   :  { %2667 = vmatpush.bf16.msra.mxu2 %v4410_v56 }
 0x19a   :  { %v2231_v5 = vadd.f32 %v2230_v44, %v2217_v63  ;;  %2854 = vmatpush.bf16.msrb.mxu1 %v4385_v48  ;;  %v4409_v63 = vld [vmem:[#allocation14 + $0x80] sm:$0xff] }
 0x19d   :  { %2668 = vmatpush.bf16.msra.mxu2 %v4409_v63 }
 0x19f   :  { %v2218_v3 = vpop.f32.mrf.mxu0  ;;  %v2232_v13 = vpop.f32.mrf.mxu1 }
 0x1a0   :  { %v2219_v10 = vadd.f32 %v2218_v3, %v1669_v57 }
 0x1a2   :  { %v2233_v16 = vadd.f32 %v2232_v13, %v2219_v10 }
 0x1a3   :  { %v2244_v6 = vpop.f32.mrf.mxu2  ;;  %v2258_v9 = vpop.f32.mrf.mxu3 }
 0x1a4   :  { %v2245_v15 = vadd.f32 %v2244_v6, %v2231_v5  ;;  %v1671_v6 = vperm.slane %v4862_v55, 2 }
 0x1a6   :  { %v2259_v20 = vadd.f32 %v2258_v9, %v2245_v15 }
 0x1a8   :  { %v2384_v24 = vmax.f32 %v2259_v20, 0.0 }
 0x1ab   :  { %v2246_v7 = vpop.f32.mrf.mxu2  ;;  %v2260_v21 = vpop.f32.mrf.mxu3 }
 0x1ac   :  { %v2247_v8 = vadd.f32 %v2246_v7, %v2233_v16 }
 0x1ae   :  { %v2261_v27 = vadd.f32 %v2260_v21, %v2247_v8 }
 0x1b0   :  { %v2387_v29 = vmax.f32 %v2261_v27, 0.0 }
 0x1b2   :  { %v2390_v34 = vpack.c.bf16 %v2387_v29, %v2384_v24 }
 0x1b4   :  { %2641 = vmatmul.bf16.vlgmr.msra.gmra.mxu0 %v2390_v34 }
 0x1b7   :  { %v2272_v41 = vpop.f32.mrf.mxu0  ;;  %v2286_v47 = vpop.f32.mrf.mxu1 }
 0x1b8   :  { %v2273_v25 = vadd.f32 %v2272_v41, %v1670_v46 }
 0x1ba   :  { %v2287_v52 = vadd.f32 %v2286_v47, %v2273_v25 }
 0x1bf   :  { %v2274_v31 = vpop.f32.mrf.mxu0  ;;  %v2288_v18 = vpop.f32.mrf.mxu1 }
 0x1c0   :  { %v2275_v53 = vadd.f32 %v2274_v31, %v1670_v46 }
 0x1c2   :  { %v2289_v59 = vadd.f32 %v2288_v18, %v2275_v53 }
 0x1c3   :  { %v2300_v17 = vpop.f32.mrf.mxu2  ;;  %v2314_v50 = vpop.f32.mrf.mxu3 }
 0x1c4   :  { %2841 = vmatmul.bf16.vlgmr.msrb.gmra.mxu0 %v2382_v51  ;;  %v2301_v45 = vadd.f32 %v2300_v17, %v2287_v52 }
 0x1c6   :  { %v2315_v44 = vadd.f32 %v2314_v50, %v2301_v45 }
 0x1c8   :  { %v2385_v1 = vmax.f32 %v2315_v44, 0.0 }
 0x1cb   :  { %v2302_v57 = vpop.f32.mrf.mxu2  ;;  %v2316_v62 = vpop.f32.mrf.mxu3 }
 0x1cc   :  { %v2303_v61 = vadd.f32 %v2302_v57, %v2289_v59 }
 0x1ce   :  { %v2317_v0 = vadd.f32 %v2316_v62, %v2303_v61 }
 0x1d0   :  { %v2388_v3 = vmax.f32 %v2317_v0, 0.0 }
 0x1d2   :  { %v2391_v4 = vpack.c.bf16 %v2388_v3, %v2385_v1 }
 0x1d4   :  { %2655 = vmatmul.bf16.vlgmr.msra.gmra.mxu1 %v2391_v4 }
 0x1d7   :  { %v2328_v5 = vpop.f32.mrf.mxu0  ;;  %v2342_v9 = vpop.f32.mrf.mxu1 }
 0x1d8   :  { %v2329_v10 = vadd.f32 %v2328_v5, %v1671_v6 }
 0x1da   :  { %v2343_v16 = vadd.f32 %v2342_v9, %v2329_v10 }
 0x1df   :  { %v2330_v13 = vpop.f32.mrf.mxu0  ;;  %v2344_v7 = vpop.f32.mrf.mxu1 }
 0x1e0   :  { %v2331_v19 = vadd.f32 %v2330_v13, %v1671_v6 }
 0x1e2   :  { %v2345_v8 = vadd.f32 %v2344_v7, %v2331_v19 }
 0x1e3   :  { %v2356_v14 = vpop.f32.mrf.mxu2  ;;  %v2370_v15 = vpop.f32.mrf.mxu3 }
 0x1e4   :  { %2855 = vmatmul.bf16.vlgmr.msrb.gmra.mxu1 %v4860_v54  ;;  %v2357_v20 = vadd.f32 %v2356_v14, %v2343_v16 }
 0x1e6   :  { %v2371_v22 = vadd.f32 %v2370_v15, %v2357_v20 }
 0x1e8   :  { %v2386_v28 = vmax.f32 %v2371_v22, 0.0 }
 0x1eb   :  { %v2358_v21 = vpop.f32.mrf.mxu2  ;;  %v2372_v24 = vpop.f32.mrf.mxu3 }
 0x1ec   :  { %v2359_v23 = vadd.f32 %v2358_v21, %v2345_v8 }
 0x1ee   :  { %v2373_v27 = vadd.f32 %v2372_v24, %v2359_v23 }
 0x1f0   :  { %v2389_v2 = vmax.f32 %v2373_v27, 0.0 }
 0x1f2   :  { %v2392_v55 = vpack.c.bf16 %v2389_v2, %v2386_v28 }
 0x1f4   :  { %2669 = vmatmul.bf16.vlgmr.msra.gmra.mxu2 %v2392_v55 }
 0x203   :  { %v2828_v37 = vpop.f32.mrf.mxu3 }
 0x20b   :  { %v2830_v47 = vpop.f32.mrf.mxu3 }
 0x231   :  { %v2642_v29 = vpop.f32.mrf.mxu0 }
 0x239   :  { %v2644_v33 = vpop.f32.mrf.mxu0 }
 0x241   :  { %v2842_v32 = vpop.f32.mrf.mxu0 }
 0x249   :  { %v2844_v60 = vpop.f32.mrf.mxu0 }
 0x251   :  { %v2656_v30 = vpop.f32.mrf.mxu1 }
 0x252   :  { %v2657_v36 = vadd.f32 %v2656_v30, %v2642_v29 }
 0x259   :  { %v2658_v34 = vpop.f32.mrf.mxu1 }
 0x25a   :  { %v2659_v42 = vadd.f32 %v2658_v34, %v2644_v33 }
 0x261   :  { %v2856_v40 = vpop.f32.mrf.mxu1 }
 0x269   :  { %v2858_v25 = vpop.f32.mrf.mxu1 }
 0x277   :  { %v2670_v38 = vpop.f32.mrf.mxu2 }
 0x278   :  { %v2671_v54 = vadd.f32 %v2670_v38, %v2657_v36 }
 0x27a   :  { %v2829_v39 = vadd.f32 %v2828_v37, %v2671_v54 }
 0x27c   :  { %v2843_v41 = vadd.f32 %v2842_v32, %v2829_v39 }
 0x27e   :  { %v2857_v58 = vadd.f32 %v2856_v40, %v2843_v41 }
 0x27f   :  { %v2672_v43 = vpop.f32.mrf.mxu2 }
 0x280   :  { %v2865_v46 = vadd.f32 %v4434_v11, %v2857_v58  ;;  %v2673_v12 = vadd.f32 %v2672_v43, %v2659_v42 }
 0x282   :  { %2867 = vst [vmem:[#allocation16] sm:$0xff] %v2865_v46  ;;  %v2831_v48 = vadd.f32 %v2830_v47, %v2673_v12 }
 0x284   :  { %v2845_v49 = vadd.f32 %v2844_v60, %v2831_v48 }
 0x286   :  { %v2859_v35 = vadd.f32 %v2858_v25, %v2845_v49 }
 0x288   :  { %v2866_v31 = vadd.f32 %v4434_v11, %v2859_v35 }
 0x28a   :  { %2868 = vst [vmem:[#allocation16 + $0x8] sm:$0xff] %v2866_v31 }
 0x28b   :  { %2881 = dma.vmem_to_hbm [thread:$0]  %s2874_s13, 256, %s2876_s16, [#allocation4], %s4678_s9, %s4678_s9, %s4679_s17  }
 0x28c   :  { %4661 = dma.done.wait [#allocation4], 256  }
 0x28d   :  { %4662 = vsyncadd [#allocation4], 4294967040 }
 0x28e   :  { %2886 = vsyncpa [#allocation3], 1 }
 0x28f   :  { %2887 = vsyncpa [#allocation6], 1 }
 0x290   :  { %2888 = vsyncpa [#allocation9], 1 }
 0x291   :  { %2889 = vsyncpa [#allocation12], 1 }
 0x292   :  { %2890 = vsyncpa [#allocation15], 1 }
 0x293   :  { %2891 = vsyncpa [#allocation4], 1 }

</bundles_post_ra>
